<compile_context>
chip_gen: v7x
topology: tpu7x:2x2x1
jax: 0.10.0
libtpu: 0.0.40
codegen_flags: <defaults>
</compile_context>

<pallas_src>
import jax
import jax.numpy as jnp
from jax.experimental import pallas as pl
from jax.experimental.pallas import tpu as pltpu

_VMEM = pl.BlockSpec(memory_space=pltpu.MemorySpace.VMEM)
_EPS = 1e-5
_LANE = 128


# --------------------------------------------------------------------------
# Fused kernel builder (static sizes / packed-vector offsets baked in)
# --------------------------------------------------------------------------
def _build_kernel(*, S, A, H, T, B, d_feat, vec_offs, O_pad):
    G = 4 * H
    D = d_feat + A

    def kernel(x_ref, wc0_ref, wc1_ref, wc2_ref, win0_ref, wrec_ref, vec_ref,
               hc_ref, out_ref, hcn_ref, hseq0_ref, hseq1_ref):

        def mm(a, b):
            return jnp.dot(a, b, preferred_element_type=jnp.float32)

        def vseg(name):
            off, w = vec_offs[name]
            return vec_ref[:, off:off + w]            # (1, w), broadcasts

        # ---- CNN feature extractor: 3 dense (Toeplitz) matmuls, all frames ----
        conv_in = x_ref[:, :S]                        # (TB, S)
        fcp = x_ref[:, S:S + A]                       # (TB, A)
        a = jnp.maximum(mm(conv_in, wc0_ref[...]) + vseg("bc0"), 0.0)
        a = jnp.maximum(mm(a, wc1_ref[...]) + vseg("bc1"), 0.0)
        feat = jnp.maximum(mm(a, wc2_ref[...]) + vseg("bc2"), 0.0)   # (TB, d_feat)

        # ---- LayerNorm over the (virtually concatenated) combined vector ----
        # Two-pass variance; affine (gamma, beta) already folded into win0 / b0.
        mu = (jnp.sum(feat, -1, keepdims=True) + jnp.sum(fcp, -1, keepdims=True)) / D
        df = feat - mu
        da = fcp - mu
        var = (jnp.sum(df * df, -1, keepdims=True)
               + jnp.sum(da * da, -1, keepdims=True)) / D
        inv = jax.lax.rsqrt(var + _EPS)
        feat_n = df * inv
        fcp_n = da * inv

        # ---- Hoisted layer-0 input projection (value, one vreg) ----
        gx0 = (mm(feat_n, win0_ref[0:d_feat, :])
               + mm(fcp_n, win0_ref[d_feat:d_feat + A, :])
               + vseg("b0"))                           # (TB, 4H)

        whh0 = wrec_ref[:, 0:G]
        whh1 = wrec_ref[:, G:2 * G]
        wih1 = wrec_ref[:, 2 * G:3 * G]
        fc2w = wrec_ref[:, 3 * G:3 * G + O_pad]
        fc1w = wrec_ref[:, 3 * G + O_pad:3 * G + O_pad + H]

        def cell(g, c_prev):
            # gates stored (i, f, o, g): sigmoid on 3H lanes, tanh on H lanes.
            sg = jax.nn.sigmoid(g[:, :3 * H])
            gg = jnp.tanh(g[:, 3 * H:])
            c = sg[:, H:2 * H] * c_prev + sg[:, :H] * gg
            h = sg[:, 2 * H:3 * H] * jnp.tanh(c)
            return h, c

        # ---- Pass 1: layer-0 recurrence (1 serial matmul per step) ----
        h0 = hc_ref[0, :, :]
        c0 = hc_ref[2, :, :]
        for t in range(T):
            h0, c0 = cell(gx0[t * B:(t + 1) * B, :] + mm(h0, whh0), c0)
            hseq0_ref[t * B:(t + 1) * B, :] = h0

        # ---- Hoisted layer-1 input projection over all timesteps ----
        gx1 = mm(hseq0_ref[...], wih1) + vseg("b1")    # (TB, 4H)

        # ---- Pass 2: layer-1 recurrence (1 serial matmul per step) ----
        h1 = hc_ref[1, :, :]
        c1 = hc_ref[3, :, :]
        for t in range(T):
            h1, c1 = cell(gx1[t * B:(t + 1) * B, :] + mm(h1, whh1), c1)
            hseq1_ref[t * B:(t + 1) * B, :] = h1

        hcn_ref[0, :, :] = h0
        hcn_ref[1, :, :] = h1
        hcn_ref[2, :, :] = c0
        hcn_ref[3, :, :] = c1

        # ---- Output head, batched over all timesteps; lane-dense store ----
        hs = hseq1_ref[...]                            # (TB, H)
        mu2 = jnp.mean(hs, -1, keepdims=True)
        d2 = hs - mu2
        var2 = jnp.mean(d2 * d2, -1, keepdims=True)
        y = d2 * jax.lax.rsqrt(var2 + _EPS)            # ln_lstm affine folded into fc1
        y = jnp.maximum(mm(y, fc1w) + vseg("fc1b"), 0.0)
        out_ref[...] = jnp.tanh(mm(y, fc2w) + vseg("fc2b"))

    return kernel


# --------------------------------------------------------------------------
# Wrapper-side weight preparation (runs ONCE, eagerly, outside the jit)
# --------------------------------------------------------------------------
def _conv_as_dense(w, b, l_in, stride, channel_major_out):
    """Expand a Conv1d weight (C_out, C_in, K) into a dense (L_in*C_in,
    L_out*C_out) matrix so the conv becomes x_2d @ W."""
    c_out, c_in, ksz = w.shape
    l_out = (l_in - ksz) // stride + 1
    vals = jnp.broadcast_to(jnp.transpose(w, (2, 1, 0))[None, :, :, :],
                            (l_out, ksz, c_in, c_out))          # [l,k,c,o] = w[o,c,k]
    rows = ((jnp.arange(l_out)[:, None, None, None] * stride
             + jnp.arange(ksz)[None, :, None, None]) * c_in
            + jnp.arange(c_in)[None, None, :, None])
    rows = jnp.broadcast_to(rows, vals.shape)
    if channel_major_out:                     # matches torch (B,C,L).view(B,-1)
        cols = (jnp.arange(c_out)[None, None, None, :] * l_out
                + jnp.arange(l_out)[:, None, None, None])
        b_exp = jnp.repeat(b, l_out)
    else:                                     # feeds next conv layer (pos-major)
        cols = (jnp.arange(l_out)[:, None, None, None] * c_out
                + jnp.arange(c_out)[None, None, None, :])
        b_exp = jnp.tile(b, l_out)
    cols = jnp.broadcast_to(cols, vals.shape)
    w_dense = jnp.zeros((l_in * c_in, l_out * c_out), jnp.float32)
    w_dense = w_dense.at[rows.reshape(-1), cols.reshape(-1)].set(vals.reshape(-1))
    return w_dense, b_exp.reshape(1, -1).astype(jnp.float32), l_out


def _pack_vectors(segs):
    """Pack (1,N) row vectors into one (1,P) array with 128-lane-aligned offsets."""
    offs, parts, cur = {}, [], 0
    for name, v in segs:
        v = jnp.reshape(v, (1, -1)).astype(jnp.float32)
        w = int(v.shape[1])
        offs[name] = (cur, w)
        pad = (-w) % _LANE
        if pad:
            v = jnp.pad(v, ((0, 0), (0, pad)))
        parts.append(v)
        cur += w + pad
    return jnp.concatenate(parts, axis=1), offs


def _permute_gates(w):
    """Columns (i,f,g,o) -> (i,f,o,g) along the last (4H) axis."""
    i, f, g, o = jnp.split(w, 4, axis=-1)
    return jnp.concatenate([i, f, o, g], axis=-1)


def prepare_params(params, cfg):
    S, A, H, O = (cfg["spectrum_size"], cfg["action_size"],
                  cfg["hidden_size"], cfg["output_size"])
    stride = cfg["stride"]
    assert len(params["conv"]) == 3, "kernel is specialized for num_layers_cnn=3"
    O_pad = max(_LANE, ((O + _LANE - 1) // _LANE) * _LANE)

    # Conv1d -> dense Toeplitz matrices (bias folded into packed vec below).
    dense_w, dense_b = [], []
    l_cur = S
    n_conv = len(params["conv"])
    for idx, (w, b) in enumerate(params["conv"]):
        wd, bd, l_cur = _conv_as_dense(w, b, l_cur, stride,
                                       channel_major_out=(idx == n_conv - 1))
        dense_w.append(wd)
        dense_b.append(bd)
    d_feat = l_cur * cfg["filters_conv"]

    # Gate permutation (i,f,g,o) -> (i,f,o,g) on every 4H-column weight/bias.
    wih0 = _permute_gates(params["wih0"])
    whh0 = _permute_gates(params["whh0"])
    wih1 = _permute_gates(params["wih1"])
    whh1 = _permute_gates(params["whh1"])
    b0 = _permute_gates(params["bih0"] + params["bhh0"])
    b1 = _permute_gates(params["bih1"] + params["bhh1"])

    # Fold ln_features affine into the layer-0 input projection.
    w_in0 = wih0 * params["lnf_g"].reshape(-1, 1)
    b0 = b0 + params["lnf_b"].reshape(1, -1) @ wih0

    # Fold ln_lstm affine into fc1.
    fc1w = params["fc1w"] * params["lnl_g"].reshape(-1, 1)
    fc1b = params["fc1b"] + params["lnl_b"].reshape(1, -1) @ params["fc1w"]

    # Pad fc2 to a lane-dense output width; wrapper slices back to O.
    fc2w = jnp.zeros((H, O_pad), jnp.float32).at[:, :O].set(params["fc2w"])
    fc2b = jnp.zeros((1, O_pad), jnp.float32).at[:, :O].set(params["fc2b"])

    # One lane-dense slab of all H-row matrices used by the recurrence / head.
    w_rec = jnp.concatenate([whh0, whh1, wih1, fc2w, fc1w], axis=1)  # (H, 3*4H+O_pad+H)

    vec, vec_offs = _pack_vectors([
        ("bc0", dense_b[0]), ("bc1", dense_b[1]), ("bc2", dense_b[2]),
        ("b0", b0), ("b1", b1), ("fc1b", fc1b), ("fc2b", fc2b)])

    arrays = {"wc0": dense_w[0], "wc1": dense_w[1], "wc2": dense_w[2],
              "w_in0": w_in0, "w_rec": w_rec, "vec": vec}
    meta = {"vec_offs": vec_offs, "d_feat": int(d_feat), "O_pad": int(O_pad)}
    return arrays, meta


# --------------------------------------------------------------------------
# Forward wrapper (jitted; prepared weights passed as arrays only)
# --------------------------------------------------------------------------
def make_forward(cfg, meta):
    S, A, H, O = (cfg["spectrum_size"], cfg["action_size"],
                  cfg["hidden_size"], cfg["output_size"])
    d_feat, vec_offs, O_pad = meta["d_feat"], meta["vec_offs"], meta["O_pad"]

    def forward(prep, inputs, hidden):
        B, T, _ = inputs.shape
        TB = T * B
        # Time-major frames (row = t*B + b): per-step slices of the hoisted
        # gate projections / hidden-sequence scratch are contiguous row blocks.
        x_tb = jnp.transpose(inputs, (1, 0, 2)).reshape(TB, S + A)
        h_init, c_init = hidden
        hc = jnp.concatenate([h_init, c_init], axis=0)          # (4, B, H)

        kernel = _build_kernel(S=S, A=A, H=H, T=T, B=B, d_feat=d_feat,
                               vec_offs=vec_offs, O_pad=O_pad)

        out_pad, hcn = pl.pallas_call(
            kernel,
            out_shape=(jax.ShapeDtypeStruct((TB, O_pad), jnp.float32),
                       jax.ShapeDtypeStruct((4, B, H), jnp.float32)),
            in_specs=[_VMEM] * 8,
            out_specs=(_VMEM, _VMEM),
            scratch_shapes=[pltpu.VMEM((TB, H), jnp.float32),   # layer-0 h sequence
                            pltpu.VMEM((TB, H), jnp.float32)],  # layer-1 h sequence
            compiler_params=pltpu.CompilerParams(
                vmem_limit_bytes=32 * 1024 * 1024),
        )(x_tb, prep["wc0"], prep["wc1"], prep["wc2"],
          prep["w_in0"], prep["w_rec"], prep["vec"], hc)

        out = jnp.transpose(out_pad[:, :O].reshape(T, B, O), (1, 0, 2))  # (B,T,O)
        return out, (hcn[:2], hcn[2:])

    return jax.jit(forward)


# --------------------------------------------------------------------------
# Deterministic parameter initialization (shapes follow the module __init__)
# --------------------------------------------------------------------------
def init_params(key, cfg):
    H = cfg["hidden_size"]
    O = cfg["output_size"]
    D_in = cfg["feature_shape"] * cfg["filters_conv"] + cfg["action_size"]
    keys = iter(jax.random.split(key, 24))

    def uni(shape, fan_in):
        bnd = 1.0 / (fan_in ** 0.5)
        return jax.random.uniform(next(keys), shape, jnp.float32, -bnd, bnd)

    conv = []
    in_c = 1
    for _ in range(cfg["num_layers_cnn"]):
        fan = in_c * cfg["kernel_size"]
        conv.append((uni((cfg["filters_conv"], in_c, cfg["kernel_size"]), fan),
                     uni((cfg["filters_conv"],), fan)))
        in_c = cfg["filters_conv"]

    return {
        "conv": conv,
        # LayerNorm params (PyTorch default init: weight=1, bias=0); kept 2D.
        "lnf_g": jnp.ones((1, D_in), jnp.float32),
        "lnf_b": jnp.zeros((1, D_in), jnp.float32),
        "lnl_g": jnp.ones((1, H), jnp.float32),
        "lnl_b": jnp.zeros((1, H), jnp.float32),
        # LSTM weights pre-transposed for x @ W; PyTorch gate order i, f, g, o.
        "wih0": uni((D_in, 4 * H), H), "whh0": uni((H, 4 * H), H),
        "bih0": uni((1, 4 * H), H),   "bhh0": uni((1, 4 * H), H),
        "wih1": uni((H, 4 * H), H),   "whh1": uni((H, 4 * H), H),
        "bih1": uni((1, 4 * H), H),   "bhh1": uni((1, 4 * H), H),
        "fc1w": uni((H, H), H), "fc1b": uni((1, H), H),
        "fc2w": uni((H, O), H), "fc2b": uni((1, O), H),
    }


if __name__ == "__main__":
    # Small hyperparameters consistent with the module's constructor arguments.
    cfg = dict(spectrum_size=64, action_size=4, hidden_size=32, output_size=4,
               num_layers_lstm=2, num_layers_cnn=3, filters_conv=8,
               stride=2, kernel_size=7)
    # feature_shape exactly as computed in ConvLSTM.__init__
    feat = int((cfg["spectrum_size"] - cfg["kernel_size"]) / cfg["stride"] + 1)
    for _ in range(cfg["num_layers_cnn"] - 1):
        feat = int((feat - cfg["kernel_size"]) / cfg["stride"] + 1)
    cfg["feature_shape"] = feat

    key = jax.random.PRNGKey(0)
    kp, kx = jax.random.split(key)
    params = init_params(kp, cfg)

    # Weight prep runs ONCE, eagerly, outside the jitted steady-state path.
    prep, meta = prepare_params(params, cfg)
    prep = jax.tree_util.tree_map(jax.block_until_ready, prep)

    B, T = 2, 4
    inputs = jax.random.normal(
        kx, (B, T, cfg["spectrum_size"] + cfg["action_size"]), jnp.float32)
    # initHidden(batch_size=B)
    hidden = (jnp.zeros((cfg["num_layers_lstm"], B, cfg["hidden_size"]), jnp.float32),
              jnp.zeros((cfg["num_layers_lstm"], B, cfg["hidden_size"]), jnp.float32))

    fwd = make_forward(cfg, meta)
    out, (hn, cn) = fwd(prep, inputs, hidden)
    jax.block_until_ready((out, hn, cn))

    assert out.shape == (B, T, cfg["output_size"])
    assert hn.shape == (cfg["num_layers_lstm"], B, cfg["hidden_size"])
    assert cn.shape == (cfg["num_layers_lstm"], B, cfg["hidden_size"])
    assert bool(jnp.all(jnp.isfinite(out)))
    assert bool(jnp.all(jnp.isfinite(hn))) and bool(jnp.all(jnp.isfinite(cn)))
    print("KERNEL_OK")
</pallas_src>

<mosaic_0001>
module attributes {stable_mosaic.version = 11 : i64} {
  func.func @kernel(%arg0: memref<8x68xf32, #tpu.memory_space<vmem>>, %arg1: memref<64x232xf32, #tpu.memory_space<vmem>>, %arg2: memref<232x96xf32, #tpu.memory_space<vmem>>, %arg3: memref<96x24xf32, #tpu.memory_space<vmem>>, %arg4: memref<28x128xf32, #tpu.memory_space<vmem>>, %arg5: memref<32x544xf32, #tpu.memory_space<vmem>>, %arg6: memref<1x1024xf32, #tpu.memory_space<vmem>>, %arg7: memref<4x2x32xf32, #tpu.memory_space<vmem>>, %arg8: memref<8x128xf32, #tpu.memory_space<vmem>>, %arg9: memref<4x2x32xf32, #tpu.memory_space<vmem>>, %arg10: memref<8x32xf32, #tpu.memory_space<vmem>>, %arg11: memref<8x32xf32, #tpu.memory_space<vmem>>) attributes {dimension_semantics = [], scalar_prefetch = 0 : i64, scratch_operands = 2 : i64, tpu.core_type = #tpu.core_type<tc>} {
    %c0 = arith.constant 0 : index
    %c0_0 = arith.constant 0 : index
    %0 = vector.load %arg0[%c0, %c0_0] : memref<8x68xf32, #tpu.memory_space<vmem>>, vector<8x64xf32>
    %c0_1 = arith.constant 0 : index
    %c64 = arith.constant 64 : index
    %1 = vector.load %arg0[%c0_1, %c64] : memref<8x68xf32, #tpu.memory_space<vmem>>, vector<8x4xf32>
    %c0_2 = arith.constant 0 : index
    %c0_3 = arith.constant 0 : index
    %2 = vector.load %arg1[%c0_2, %c0_3] : memref<64x232xf32, #tpu.memory_space<vmem>>, vector<64x232xf32>
    %cst = arith.constant dense<0.000000e+00> : vector<8x232xf32>
    %3 = tpu.matmul %0, %2, %cst {dimension_numbers = #tpu.dot_dimension_numbers<[1], [0], [0], [1], [0, 0, 1, 1], [], []>} : vector<8x64xf32>, vector<64x232xf32>, vector<8x232xf32> -> vector<8x232xf32>
    %c0_4 = arith.constant 0 : index
    %c0_5 = arith.constant 0 : index
    %4 = vector.load %arg6[%c0_4, %c0_5] : memref<1x1024xf32, #tpu.memory_space<vmem>>, vector<1x232xf32>
    %5 = vector.broadcast %4 : vector<1x232xf32> to vector<8x232xf32>
    %6 = arith.addf %3, %5 : vector<8x232xf32>
    %cst_6 = arith.constant 0.000000e+00 : f32
    %7 = vector.broadcast %cst_6 : f32 to vector<8x232xf32>
    %8 = arith.maximumf %6, %7 : vector<8x232xf32>
    %c0_7 = arith.constant 0 : index
    %c0_8 = arith.constant 0 : index
    %9 = vector.load %arg2[%c0_7, %c0_8] : memref<232x96xf32, #tpu.memory_space<vmem>>, vector<232x96xf32>
    %cst_9 = arith.constant dense<0.000000e+00> : vector<8x96xf32>
    %10 = tpu.matmul %8, %9, %cst_9 {dimension_numbers = #tpu.dot_dimension_numbers<[1], [0], [0], [1], [0, 0, 1, 1], [], []>} : vector<8x232xf32>, vector<232x96xf32>, vector<8x96xf32> -> vector<8x96xf32>
    %c0_10 = arith.constant 0 : index
    %c256 = arith.constant 256 : index
    %11 = vector.load %arg6[%c0_10, %c256] : memref<1x1024xf32, #tpu.memory_space<vmem>>, vector<1x96xf32>
    %12 = vector.broadcast %11 : vector<1x96xf32> to vector<8x96xf32>
    %13 = arith.addf %10, %12 : vector<8x96xf32>
    %cst_11 = arith.constant 0.000000e+00 : f32
    %14 = vector.broadcast %cst_11 : f32 to vector<8x96xf32>
    %15 = arith.maximumf %13, %14 : vector<8x96xf32>
    %c0_12 = arith.constant 0 : index
    %c0_13 = arith.constant 0 : index
    %16 = vector.load %arg3[%c0_12, %c0_13] : memref<96x24xf32, #tpu.memory_space<vmem>>, vector<96x24xf32>
    %cst_14 = arith.constant dense<0.000000e+00> : vector<8x24xf32>
    %17 = tpu.matmul %15, %16, %cst_14 {dimension_numbers = #tpu.dot_dimension_numbers<[1], [0], [0], [1], [0, 0, 1, 1], [], []>} : vector<8x96xf32>, vector<96x24xf32>, vector<8x24xf32> -> vector<8x24xf32>
    %c0_15 = arith.constant 0 : index
    %c384 = arith.constant 384 : index
    %18 = vector.load %arg6[%c0_15, %c384] : memref<1x1024xf32, #tpu.memory_space<vmem>>, vector<1x24xf32>
    %19 = vector.broadcast %18 : vector<1x24xf32> to vector<8x24xf32>
    %20 = arith.addf %17, %19 : vector<8x24xf32>
    %cst_16 = arith.constant 0.000000e+00 : f32
    %21 = vector.broadcast %cst_16 : f32 to vector<8x24xf32>
    %22 = arith.maximumf %20, %21 : vector<8x24xf32>
    %cst_17 = arith.constant dense<0.000000e+00> : vector<8xf32>
    %23 = vector.multi_reduction <add>, %22, %cst_17 [1] : vector<8x24xf32> to vector<8xf32>
    %24 = vector.shape_cast %23 : vector<8xf32> to vector<8x1xf32>
    %cst_18 = arith.constant dense<0.000000e+00> : vector<8xf32>
    %25 = vector.multi_reduction <add>, %1, %cst_18 [1] : vector<8x4xf32> to vector<8xf32>
    %26 = vector.shape_cast %25 : vector<8xf32> to vector<8x1xf32>
    %27 = arith.addf %24, %26 : vector<8x1xf32>
    %cst_19 = arith.constant 2.800000e+01 : f32
    %28 = vector.broadcast %cst_19 : f32 to vector<8x1xf32>
    %29 = arith.divf %27, %28 : vector<8x1xf32>
    %30 = vector.broadcast %29 : vector<8x1xf32> to vector<8x24xf32>
    %31 = arith.subf %22, %30 : vector<8x24xf32>
    %32 = vector.broadcast %29 : vector<8x1xf32> to vector<8x4xf32>
    %33 = arith.subf %1, %32 : vector<8x4xf32>
    %34 = arith.mulf %31, %31 : vector<8x24xf32>
    %cst_20 = arith.constant dense<0.000000e+00> : vector<8xf32>
    %35 = vector.multi_reduction <add>, %34, %cst_20 [1] : vector<8x24xf32> to vector<8xf32>
    %36 = vector.shape_cast %35 : vector<8xf32> to vector<8x1xf32>
    %37 = arith.mulf %33, %33 : vector<8x4xf32>
    %cst_21 = arith.constant dense<0.000000e+00> : vector<8xf32>
    %38 = vector.multi_reduction <add>, %37, %cst_21 [1] : vector<8x4xf32> to vector<8xf32>
    %39 = vector.shape_cast %38 : vector<8xf32> to vector<8x1xf32>
    %40 = arith.addf %36, %39 : vector<8x1xf32>
    %cst_22 = arith.constant 2.800000e+01 : f32
    %41 = vector.broadcast %cst_22 : f32 to vector<8x1xf32>
    %42 = arith.divf %40, %41 : vector<8x1xf32>
    %cst_23 = arith.constant 9.99999974E-6 : f32
    %43 = vector.broadcast %cst_23 : f32 to vector<8x1xf32>
    %44 = arith.addf %42, %43 : vector<8x1xf32>
    %45 = math.rsqrt %44 : vector<8x1xf32>
    %46 = vector.broadcast %45 : vector<8x1xf32> to vector<8x24xf32>
    %47 = arith.mulf %31, %46 : vector<8x24xf32>
    %48 = vector.broadcast %45 : vector<8x1xf32> to vector<8x4xf32>
    %49 = arith.mulf %33, %48 : vector<8x4xf32>
    %c0_24 = arith.constant 0 : index
    %c0_25 = arith.constant 0 : index
    %50 = vector.load %arg4[%c0_24, %c0_25] : memref<28x128xf32, #tpu.memory_space<vmem>>, vector<24x128xf32>
    %cst_26 = arith.constant dense<0.000000e+00> : vector<8x128xf32>
    %51 = tpu.matmul %47, %50, %cst_26 {dimension_numbers = #tpu.dot_dimension_numbers<[1], [0], [0], [1], [0, 0, 1, 1], [], []>} : vector<8x24xf32>, vector<24x128xf32>, vector<8x128xf32> -> vector<8x128xf32>
    %c24 = arith.constant 24 : index
    %c0_27 = arith.constant 0 : index
    %52 = vector.load %arg4[%c24, %c0_27] : memref<28x128xf32, #tpu.memory_space<vmem>>, vector<4x128xf32>
    %cst_28 = arith.constant dense<0.000000e+00> : vector<8x128xf32>
    %53 = tpu.matmul %49, %52, %cst_28 {dimension_numbers = #tpu.dot_dimension_numbers<[1], [0], [0], [1], [0, 0, 1, 1], [], []>} : vector<8x4xf32>, vector<4x128xf32>, vector<8x128xf32> -> vector<8x128xf32>
    %54 = arith.addf %51, %53 : vector<8x128xf32>
    %c0_29 = arith.constant 0 : index
    %c512 = arith.constant 512 : index
    %55 = vector.load %arg6[%c0_29, %c512] : memref<1x1024xf32, #tpu.memory_space<vmem>>, vector<1x128xf32>
    %56 = vector.broadcast %55 : vector<1x128xf32> to vector<8x128xf32>
    %57 = arith.addf %54, %56 : vector<8x128xf32>
    %c0_30 = arith.constant 0 : index
    %c0_31 = arith.constant 0 : index
    %58 = vector.load %arg5[%c0_30, %c0_31] : memref<32x544xf32, #tpu.memory_space<vmem>>, vector<32x128xf32>
    %c0_32 = arith.constant 0 : index
    %c128 = arith.constant 128 : index
    %59 = vector.load %arg5[%c0_32, %c128] : memref<32x544xf32, #tpu.memory_space<vmem>>, vector<32x128xf32>
    %c0_33 = arith.constant 0 : index
    %c256_34 = arith.constant 256 : index
    %60 = vector.load %arg5[%c0_33, %c256_34] : memref<32x544xf32, #tpu.memory_space<vmem>>, vector<32x128xf32>
    %c0_35 = arith.constant 0 : index
    %c384_36 = arith.constant 384 : index
    %61 = vector.load %arg5[%c0_35, %c384_36] : memref<32x544xf32, #tpu.memory_space<vmem>>, vector<32x128xf32>
    %c0_37 = arith.constant 0 : index
    %c512_38 = arith.constant 512 : index
    %62 = vector.load %arg5[%c0_37, %c512_38] : memref<32x544xf32, #tpu.memory_space<vmem>>, vector<32x32xf32>
    %c0_39 = arith.constant 0 : index
    %c0_40 = arith.constant 0 : index
    %c0_41 = arith.constant 0 : index
    %63 = vector.load %arg7[%c0_39, %c0_40, %c0_41] : memref<4x2x32xf32, #tpu.memory_space<vmem>>, vector<1x2x32xf32>
    %64 = vector.shape_cast %63 : vector<1x2x32xf32> to vector<2x32xf32>
    %c2 = arith.constant 2 : index
    %c0_42 = arith.constant 0 : index
    %c0_43 = arith.constant 0 : index
    %65 = vector.load %arg7[%c2, %c0_42, %c0_43] : memref<4x2x32xf32, #tpu.memory_space<vmem>>, vector<1x2x32xf32>
    %66 = vector.shape_cast %65 : vector<1x2x32xf32> to vector<2x32xf32>
    %67 = vector.extract_strided_slice %57 {offsets = [0, 0], sizes = [2, 128], strides = [1, 1]} : vector<8x128xf32> to vector<2x128xf32>
    %cst_44 = arith.constant dense<0.000000e+00> : vector<2x128xf32>
    %68 = tpu.matmul %64, %58, %cst_44 {dimension_numbers = #tpu.dot_dimension_numbers<[1], [0], [0], [1], [0, 0, 1, 1], [], []>} : vector<2x32xf32>, vector<32x128xf32>, vector<2x128xf32> -> vector<2x128xf32>
    %69 = arith.addf %67, %68 : vector<2x128xf32>
    %70 = vector.extract_strided_slice %69 {offsets = [0, 0], sizes = [2, 96], strides = [1, 1]} : vector<2x128xf32> to vector<2x96xf32>
    %71 = arith.negf %70 : vector<2x96xf32>
    %72 = math.exp %71 : vector<2x96xf32>
    %cst_45 = arith.constant 1.000000e+00 : f32
    %73 = vector.broadcast %cst_45 : f32 to vector<2x96xf32>
    %74 = arith.addf %73, %72 : vector<2x96xf32>
    %75 = arith.divf %73, %74 : vector<2x96xf32>
    %76 = vector.extract_strided_slice %69 {offsets = [0, 96], sizes = [2, 32], strides = [1, 1]} : vector<2x128xf32> to vector<2x32xf32>
    %77 = math.tanh %76 : vector<2x32xf32>
    %78 = vector.extract_strided_slice %75 {offsets = [0, 32], sizes = [2, 32], strides = [1, 1]} : vector<2x96xf32> to vector<2x32xf32>
    %79 = arith.mulf %78, %66 : vector<2x32xf32>
    %80 = vector.extract_strided_slice %75 {offsets = [0, 0], sizes = [2, 32], strides = [1, 1]} : vector<2x96xf32> to vector<2x32xf32>
    %81 = arith.mulf %80, %77 : vector<2x32xf32>
    %82 = arith.addf %79, %81 : vector<2x32xf32>
    %83 = vector.extract_strided_slice %75 {offsets = [0, 64], sizes = [2, 32], strides = [1, 1]} : vector<2x96xf32> to vector<2x32xf32>
    %84 = math.tanh %82 : vector<2x32xf32>
    %85 = arith.mulf %83, %84 : vector<2x32xf32>
    %c0_46 = arith.constant 0 : index
    %c0_47 = arith.constant 0 : index
    %86 = vector.load %arg10[%c0_46, %c0_47] : memref<8x32xf32, #tpu.memory_space<vmem>>, vector<2x32xf32>
    tpu.vector_store %arg10[%c0_46, %c0_47], %85 {strides = array<i32>} : memref<8x32xf32, #tpu.memory_space<vmem>>, vector<2x32xf32>,
    %87 = vector.extract_strided_slice %57 {offsets = [2, 0], sizes = [2, 128], strides = [1, 1]} : vector<8x128xf32> to vector<2x128xf32>
    %cst_48 = arith.constant dense<0.000000e+00> : vector<2x128xf32>
    %88 = tpu.matmul %85, %58, %cst_48 {dimension_numbers = #tpu.dot_dimension_numbers<[1], [0], [0], [1], [0, 0, 1, 1], [], []>} : vector<2x32xf32>, vector<32x128xf32>, vector<2x128xf32> -> vector<2x128xf32>
    %89 = arith.addf %87, %88 : vector<2x128xf32>
    %90 = vector.extract_strided_slice %89 {offsets = [0, 0], sizes = [2, 96], strides = [1, 1]} : vector<2x128xf32> to vector<2x96xf32>
    %91 = arith.negf %90 : vector<2x96xf32>
    %92 = math.exp %91 : vector<2x96xf32>
    %cst_49 = arith.constant 1.000000e+00 : f32
    %93 = vector.broadcast %cst_49 : f32 to vector<2x96xf32>
    %94 = arith.addf %93, %92 : vector<2x96xf32>
    %95 = arith.divf %93, %94 : vector<2x96xf32>
    %96 = vector.extract_strided_slice %89 {offsets = [0, 96], sizes = [2, 32], strides = [1, 1]} : vector<2x128xf32> to vector<2x32xf32>
    %97 = math.tanh %96 : vector<2x32xf32>
    %98 = vector.extract_strided_slice %95 {offsets = [0, 32], sizes = [2, 32], strides = [1, 1]} : vector<2x96xf32> to vector<2x32xf32>
    %99 = arith.mulf %98, %82 : vector<2x32xf32>
    %100 = vector.extract_strided_slice %95 {offsets = [0, 0], sizes = [2, 32], strides = [1, 1]} : vector<2x96xf32> to vector<2x32xf32>
    %101 = arith.mulf %100, %97 : vector<2x32xf32>
    %102 = arith.addf %99, %101 : vector<2x32xf32>
    %103 = vector.extract_strided_slice %95 {offsets = [0, 64], sizes = [2, 32], strides = [1, 1]} : vector<2x96xf32> to vector<2x32xf32>
    %104 = math.tanh %102 : vector<2x32xf32>
    %105 = arith.mulf %103, %104 : vector<2x32xf32>
    %c2_50 = arith.constant 2 : index
    %c0_51 = arith.constant 0 : index
    %106 = vector.load %arg10[%c2_50, %c0_51] : memref<8x32xf32, #tpu.memory_space<vmem>>, vector<2x32xf32>
    tpu.vector_store %arg10[%c2_50, %c0_51], %105 {strides = array<i32>} : memref<8x32xf32, #tpu.memory_space<vmem>>, vector<2x32xf32>,
    %107 = vector.extract_strided_slice %57 {offsets = [4, 0], sizes = [2, 128], strides = [1, 1]} : vector<8x128xf32> to vector<2x128xf32>
    %cst_52 = arith.constant dense<0.000000e+00> : vector<2x128xf32>
    %108 = tpu.matmul %105, %58, %cst_52 {dimension_numbers = #tpu.dot_dimension_numbers<[1], [0], [0], [1], [0, 0, 1, 1], [], []>} : vector<2x32xf32>, vector<32x128xf32>, vector<2x128xf32> -> vector<2x128xf32>
    %109 = arith.addf %107, %108 : vector<2x128xf32>
    %110 = vector.extract_strided_slice %109 {offsets = [0, 0], sizes = [2, 96], strides = [1, 1]} : vector<2x128xf32> to vector<2x96xf32>
    %111 = arith.negf %110 : vector<2x96xf32>
    %112 = math.exp %111 : vector<2x96xf32>
    %cst_53 = arith.constant 1.000000e+00 : f32
    %113 = vector.broadcast %cst_53 : f32 to vector<2x96xf32>
    %114 = arith.addf %113, %112 : vector<2x96xf32>
    %115 = arith.divf %113, %114 : vector<2x96xf32>
    %116 = vector.extract_strided_slice %109 {offsets = [0, 96], sizes = [2, 32], strides = [1, 1]} : vector<2x128xf32> to vector<2x32xf32>
    %117 = math.tanh %116 : vector<2x32xf32>
    %118 = vector.extract_strided_slice %115 {offsets = [0, 32], sizes = [2, 32], strides = [1, 1]} : vector<2x96xf32> to vector<2x32xf32>
    %119 = arith.mulf %118, %102 : vector<2x32xf32>
    %120 = vector.extract_strided_slice %115 {offsets = [0, 0], sizes = [2, 32], strides = [1, 1]} : vector<2x96xf32> to vector<2x32xf32>
    %121 = arith.mulf %120, %117 : vector<2x32xf32>
    %122 = arith.addf %119, %121 : vector<2x32xf32>
    %123 = vector.extract_strided_slice %115 {offsets = [0, 64], sizes = [2, 32], strides = [1, 1]} : vector<2x96xf32> to vector<2x32xf32>
    %124 = math.tanh %122 : vector<2x32xf32>
    %125 = arith.mulf %123, %124 : vector<2x32xf32>
    %c4 = arith.constant 4 : index
    %c0_54 = arith.constant 0 : index
    %126 = vector.load %arg10[%c4, %c0_54] : memref<8x32xf32, #tpu.memory_space<vmem>>, vector<2x32xf32>
    tpu.vector_store %arg10[%c4, %c0_54], %125 {strides = array<i32>} : memref<8x32xf32, #tpu.memory_space<vmem>>, vector<2x32xf32>,
    %127 = vector.extract_strided_slice %57 {offsets = [6, 0], sizes = [2, 128], strides = [1, 1]} : vector<8x128xf32> to vector<2x128xf32>
    %cst_55 = arith.constant dense<0.000000e+00> : vector<2x128xf32>
    %128 = tpu.matmul %125, %58, %cst_55 {dimension_numbers = #tpu.dot_dimension_numbers<[1], [0], [0], [1], [0, 0, 1, 1], [], []>} : vector<2x32xf32>, vector<32x128xf32>, vector<2x128xf32> -> vector<2x128xf32>
    %129 = arith.addf %127, %128 : vector<2x128xf32>
    %130 = vector.extract_strided_slice %129 {offsets = [0, 0], sizes = [2, 96], strides = [1, 1]} : vector<2x128xf32> to vector<2x96xf32>
    %131 = arith.negf %130 : vector<2x96xf32>
    %132 = math.exp %131 : vector<2x96xf32>
    %cst_56 = arith.constant 1.000000e+00 : f32
    %133 = vector.broadcast %cst_56 : f32 to vector<2x96xf32>
    %134 = arith.addf %133, %132 : vector<2x96xf32>
    %135 = arith.divf %133, %134 : vector<2x96xf32>
    %136 = vector.extract_strided_slice %129 {offsets = [0, 96], sizes = [2, 32], strides = [1, 1]} : vector<2x128xf32> to vector<2x32xf32>
    %137 = math.tanh %136 : vector<2x32xf32>
    %138 = vector.extract_strided_slice %135 {offsets = [0, 32], sizes = [2, 32], strides = [1, 1]} : vector<2x96xf32> to vector<2x32xf32>
    %139 = arith.mulf %138, %122 : vector<2x32xf32>
    %140 = vector.extract_strided_slice %135 {offsets = [0, 0], sizes = [2, 32], strides = [1, 1]} : vector<2x96xf32> to vector<2x32xf32>
    %141 = arith.mulf %140, %137 : vector<2x32xf32>
    %142 = arith.addf %139, %141 : vector<2x32xf32>
    %143 = vector.extract_strided_slice %135 {offsets = [0, 64], sizes = [2, 32], strides = [1, 1]} : vector<2x96xf32> to vector<2x32xf32>
    %144 = math.tanh %142 : vector<2x32xf32>
    %145 = arith.mulf %143, %144 : vector<2x32xf32>
    %c6 = arith.constant 6 : index
    %c0_57 = arith.constant 0 : index
    %146 = vector.load %arg10[%c6, %c0_57] : memref<8x32xf32, #tpu.memory_space<vmem>>, vector<2x32xf32>
    tpu.vector_store %arg10[%c6, %c0_57], %145 {strides = array<i32>} : memref<8x32xf32, #tpu.memory_space<vmem>>, vector<2x32xf32>,
    %c0_58 = arith.constant 0 : index
    %c0_59 = arith.constant 0 : index
    %147 = vector.load %arg10[%c0_58, %c0_59] : memref<8x32xf32, #tpu.memory_space<vmem>>, vector<8x32xf32>
    %cst_60 = arith.constant dense<0.000000e+00> : vector<8x128xf32>
    %148 = tpu.matmul %147, %60, %cst_60 {dimension_numbers = #tpu.dot_dimension_numbers<[1], [0], [0], [1], [0, 0, 1, 1], [], []>} : vector<8x32xf32>, vector<32x128xf32>, vector<8x128xf32> -> vector<8x128xf32>
    %c0_61 = arith.constant 0 : index
    %c640 = arith.constant 640 : index
    %149 = vector.load %arg6[%c0_61, %c640] : memref<1x1024xf32, #tpu.memory_space<vmem>>, vector<1x128xf32>
    %150 = vector.broadcast %149 : vector<1x128xf32> to vector<8x128xf32>
    %151 = arith.addf %148, %150 : vector<8x128xf32>
    %c1 = arith.constant 1 : index
    %c0_62 = arith.constant 0 : index
    %c0_63 = arith.constant 0 : index
    %152 = vector.load %arg7[%c1, %c0_62, %c0_63] : memref<4x2x32xf32, #tpu.memory_space<vmem>>, vector<1x2x32xf32>
    %153 = vector.shape_cast %152 : vector<1x2x32xf32> to vector<2x32xf32>
    %c3 = arith.constant 3 : index
    %c0_64 = arith.constant 0 : index
    %c0_65 = arith.constant 0 : index
    %154 = vector.load %arg7[%c3, %c0_64, %c0_65] : memref<4x2x32xf32, #tpu.memory_space<vmem>>, vector<1x2x32xf32>
    %155 = vector.shape_cast %154 : vector<1x2x32xf32> to vector<2x32xf32>
    %156 = vector.extract_strided_slice %151 {offsets = [0, 0], sizes = [2, 128], strides = [1, 1]} : vector<8x128xf32> to vector<2x128xf32>
    %cst_66 = arith.constant dense<0.000000e+00> : vector<2x128xf32>
    %157 = tpu.matmul %153, %59, %cst_66 {dimension_numbers = #tpu.dot_dimension_numbers<[1], [0], [0], [1], [0, 0, 1, 1], [], []>} : vector<2x32xf32>, vector<32x128xf32>, vector<2x128xf32> -> vector<2x128xf32>
    %158 = arith.addf %156, %157 : vector<2x128xf32>
    %159 = vector.extract_strided_slice %158 {offsets = [0, 0], sizes = [2, 96], strides = [1, 1]} : vector<2x128xf32> to vector<2x96xf32>
    %160 = arith.negf %159 : vector<2x96xf32>
    %161 = math.exp %160 : vector<2x96xf32>
    %cst_67 = arith.constant 1.000000e+00 : f32
    %162 = vector.broadcast %cst_67 : f32 to vector<2x96xf32>
    %163 = arith.addf %162, %161 : vector<2x96xf32>
    %164 = arith.divf %162, %163 : vector<2x96xf32>
    %165 = vector.extract_strided_slice %158 {offsets = [0, 96], sizes = [2, 32], strides = [1, 1]} : vector<2x128xf32> to vector<2x32xf32>
    %166 = math.tanh %165 : vector<2x32xf32>
    %167 = vector.extract_strided_slice %164 {offsets = [0, 32], sizes = [2, 32], strides = [1, 1]} : vector<2x96xf32> to vector<2x32xf32>
    %168 = arith.mulf %167, %155 : vector<2x32xf32>
    %169 = vector.extract_strided_slice %164 {offsets = [0, 0], sizes = [2, 32], strides = [1, 1]} : vector<2x96xf32> to vector<2x32xf32>
    %170 = arith.mulf %169, %166 : vector<2x32xf32>
    %171 = arith.addf %168, %170 : vector<2x32xf32>
    %172 = vector.extract_strided_slice %164 {offsets = [0, 64], sizes = [2, 32], strides = [1, 1]} : vector<2x96xf32> to vector<2x32xf32>
    %173 = math.tanh %171 : vector<2x32xf32>
    %174 = arith.mulf %172, %173 : vector<2x32xf32>
    %c0_68 = arith.constant 0 : index
    %c0_69 = arith.constant 0 : index
    %175 = vector.load %arg11[%c0_68, %c0_69] : memref<8x32xf32, #tpu.memory_space<vmem>>, vector<2x32xf32>
    tpu.vector_store %arg11[%c0_68, %c0_69], %174 {strides = array<i32>} : memref<8x32xf32, #tpu.memory_space<vmem>>, vector<2x32xf32>,
    %176 = vector.extract_strided_slice %151 {offsets = [2, 0], sizes = [2, 128], strides = [1, 1]} : vector<8x128xf32> to vector<2x128xf32>
    %cst_70 = arith.constant dense<0.000000e+00> : vector<2x128xf32>
    %177 = tpu.matmul %174, %59, %cst_70 {dimension_numbers = #tpu.dot_dimension_numbers<[1], [0], [0], [1], [0, 0, 1, 1], [], []>} : vector<2x32xf32>, vector<32x128xf32>, vector<2x128xf32> -> vector<2x128xf32>
    %178 = arith.addf %176, %177 : vector<2x128xf32>
    %179 = vector.extract_strided_slice %178 {offsets = [0, 0], sizes = [2, 96], strides = [1, 1]} : vector<2x128xf32> to vector<2x96xf32>
    %180 = arith.negf %179 : vector<2x96xf32>
    %181 = math.exp %180 : vector<2x96xf32>
    %cst_71 = arith.constant 1.000000e+00 : f32
    %182 = vector.broadcast %cst_71 : f32 to vector<2x96xf32>
    %183 = arith.addf %182, %181 : vector<2x96xf32>
    %184 = arith.divf %182, %183 : vector<2x96xf32>
    %185 = vector.extract_strided_slice %178 {offsets = [0, 96], sizes = [2, 32], strides = [1, 1]} : vector<2x128xf32> to vector<2x32xf32>
    %186 = math.tanh %185 : vector<2x32xf32>
    %187 = vector.extract_strided_slice %184 {offsets = [0, 32], sizes = [2, 32], strides = [1, 1]} : vector<2x96xf32> to vector<2x32xf32>
    %188 = arith.mulf %187, %171 : vector<2x32xf32>
    %189 = vector.extract_strided_slice %184 {offsets = [0, 0], sizes = [2, 32], strides = [1, 1]} : vector<2x96xf32> to vector<2x32xf32>
    %190 = arith.mulf %189, %186 : vector<2x32xf32>
    %191 = arith.addf %188, %190 : vector<2x32xf32>
    %192 = vector.extract_strided_slice %184 {offsets = [0, 64], sizes = [2, 32], strides = [1, 1]} : vector<2x96xf32> to vector<2x32xf32>
    %193 = math.tanh %191 : vector<2x32xf32>
    %194 = arith.mulf %192, %193 : vector<2x32xf32>
    %c2_72 = arith.constant 2 : index
    %c0_73 = arith.constant 0 : index
    %195 = vector.load %arg11[%c2_72, %c0_73] : memref<8x32xf32, #tpu.memory_space<vmem>>, vector<2x32xf32>
    tpu.vector_store %arg11[%c2_72, %c0_73], %194 {strides = array<i32>} : memref<8x32xf32, #tpu.memory_space<vmem>>, vector<2x32xf32>,
    %196 = vector.extract_strided_slice %151 {offsets = [4, 0], sizes = [2, 128], strides = [1, 1]} : vector<8x128xf32> to vector<2x128xf32>
    %cst_74 = arith.constant dense<0.000000e+00> : vector<2x128xf32>
    %197 = tpu.matmul %194, %59, %cst_74 {dimension_numbers = #tpu.dot_dimension_numbers<[1], [0], [0], [1], [0, 0, 1, 1], [], []>} : vector<2x32xf32>, vector<32x128xf32>, vector<2x128xf32> -> vector<2x128xf32>
    %198 = arith.addf %196, %197 : vector<2x128xf32>
    %199 = vector.extract_strided_slice %198 {offsets = [0, 0], sizes = [2, 96], strides = [1, 1]} : vector<2x128xf32> to vector<2x96xf32>
    %200 = arith.negf %199 : vector<2x96xf32>
    %201 = math.exp %200 : vector<2x96xf32>
    %cst_75 = arith.constant 1.000000e+00 : f32
    %202 = vector.broadcast %cst_75 : f32 to vector<2x96xf32>
    %203 = arith.addf %202, %201 : vector<2x96xf32>
    %204 = arith.divf %202, %203 : vector<2x96xf32>
    %205 = vector.extract_strided_slice %198 {offsets = [0, 96], sizes = [2, 32], strides = [1, 1]} : vector<2x128xf32> to vector<2x32xf32>
    %206 = math.tanh %205 : vector<2x32xf32>
    %207 = vector.extract_strided_slice %204 {offsets = [0, 32], sizes = [2, 32], strides = [1, 1]} : vector<2x96xf32> to vector<2x32xf32>
    %208 = arith.mulf %207, %191 : vector<2x32xf32>
    %209 = vector.extract_strided_slice %204 {offsets = [0, 0], sizes = [2, 32], strides = [1, 1]} : vector<2x96xf32> to vector<2x32xf32>
    %210 = arith.mulf %209, %206 : vector<2x32xf32>
    %211 = arith.addf %208, %210 : vector<2x32xf32>
    %212 = vector.extract_strided_slice %204 {offsets = [0, 64], sizes = [2, 32], strides = [1, 1]} : vector<2x96xf32> to vector<2x32xf32>
    %213 = math.tanh %211 : vector<2x32xf32>
    %214 = arith.mulf %212, %213 : vector<2x32xf32>
    %c4_76 = arith.constant 4 : index
    %c0_77 = arith.constant 0 : index
    %215 = vector.load %arg11[%c4_76, %c0_77] : memref<8x32xf32, #tpu.memory_space<vmem>>, vector<2x32xf32>
    tpu.vector_store %arg11[%c4_76, %c0_77], %214 {strides = array<i32>} : memref<8x32xf32, #tpu.memory_space<vmem>>, vector<2x32xf32>,
    %216 = vector.extract_strided_slice %151 {offsets = [6, 0], sizes = [2, 128], strides = [1, 1]} : vector<8x128xf32> to vector<2x128xf32>
    %cst_78 = arith.constant dense<0.000000e+00> : vector<2x128xf32>
    %217 = tpu.matmul %214, %59, %cst_78 {dimension_numbers = #tpu.dot_dimension_numbers<[1], [0], [0], [1], [0, 0, 1, 1], [], []>} : vector<2x32xf32>, vector<32x128xf32>, vector<2x128xf32> -> vector<2x128xf32>
    %218 = arith.addf %216, %217 : vector<2x128xf32>
    %219 = vector.extract_strided_slice %218 {offsets = [0, 0], sizes = [2, 96], strides = [1, 1]} : vector<2x128xf32> to vector<2x96xf32>
    %220 = arith.negf %219 : vector<2x96xf32>
    %221 = math.exp %220 : vector<2x96xf32>
    %cst_79 = arith.constant 1.000000e+00 : f32
    %222 = vector.broadcast %cst_79 : f32 to vector<2x96xf32>
    %223 = arith.addf %222, %221 : vector<2x96xf32>
    %224 = arith.divf %222, %223 : vector<2x96xf32>
    %225 = vector.extract_strided_slice %218 {offsets = [0, 96], sizes = [2, 32], strides = [1, 1]} : vector<2x128xf32> to vector<2x32xf32>
    %226 = math.tanh %225 : vector<2x32xf32>
    %227 = vector.extract_strided_slice %224 {offsets = [0, 32], sizes = [2, 32], strides = [1, 1]} : vector<2x96xf32> to vector<2x32xf32>
    %228 = arith.mulf %227, %211 : vector<2x32xf32>
    %229 = vector.extract_strided_slice %224 {offsets = [0, 0], sizes = [2, 32], strides = [1, 1]} : vector<2x96xf32> to vector<2x32xf32>
    %230 = arith.mulf %229, %226 : vector<2x32xf32>
    %231 = arith.addf %228, %230 : vector<2x32xf32>
    %232 = vector.extract_strided_slice %224 {offsets = [0, 64], sizes = [2, 32], strides = [1, 1]} : vector<2x96xf32> to vector<2x32xf32>
    %233 = math.tanh %231 : vector<2x32xf32>
    %234 = arith.mulf %232, %233 : vector<2x32xf32>
    %c6_80 = arith.constant 6 : index
    %c0_81 = arith.constant 0 : index
    %235 = vector.load %arg11[%c6_80, %c0_81] : memref<8x32xf32, #tpu.memory_space<vmem>>, vector<2x32xf32>
    tpu.vector_store %arg11[%c6_80, %c0_81], %234 {strides = array<i32>} : memref<8x32xf32, #tpu.memory_space<vmem>>, vector<2x32xf32>,
    %c0_82 = arith.constant 0 : index
    %c0_83 = arith.constant 0 : index
    %c0_84 = arith.constant 0 : index
    %236 = vector.load %arg9[%c0_82, %c0_83, %c0_84] : memref<4x2x32xf32, #tpu.memory_space<vmem>>, vector<1x2x32xf32>
    %237 = vector.shape_cast %236 : vector<1x2x32xf32> to vector<2x32xf32>
    %238 = vector.shape_cast %145 : vector<2x32xf32> to vector<1x2x32xf32>
    tpu.vector_store %arg9[%c0_82, %c0_83, %c0_84], %238 {strides = array<i32>} : memref<4x2x32xf32, #tpu.memory_space<vmem>>, vector<1x2x32xf32>,
    %c1_85 = arith.constant 1 : index
    %c0_86 = arith.constant 0 : index
    %c0_87 = arith.constant 0 : index
    %239 = vector.load %arg9[%c1_85, %c0_86, %c0_87] : memref<4x2x32xf32, #tpu.memory_space<vmem>>, vector<1x2x32xf32>
    %240 = vector.shape_cast %239 : vector<1x2x32xf32> to vector<2x32xf32>
    %241 = vector.shape_cast %234 : vector<2x32xf32> to vector<1x2x32xf32>
    tpu.vector_store %arg9[%c1_85, %c0_86, %c0_87], %241 {strides = array<i32>} : memref<4x2x32xf32, #tpu.memory_space<vmem>>, vector<1x2x32xf32>,
    %c2_88 = arith.constant 2 : index
    %c0_89 = arith.constant 0 : index
    %c0_90 = arith.constant 0 : index
    %242 = vector.load %arg9[%c2_88, %c0_89, %c0_90] : memref<4x2x32xf32, #tpu.memory_space<vmem>>, vector<1x2x32xf32>
    %243 = vector.shape_cast %242 : vector<1x2x32xf32> to vector<2x32xf32>
    %244 = vector.shape_cast %142 : vector<2x32xf32> to vector<1x2x32xf32>
    tpu.vector_store %arg9[%c2_88, %c0_89, %c0_90], %244 {strides = array<i32>} : memref<4x2x32xf32, #tpu.memory_space<vmem>>, vector<1x2x32xf32>,
    %c3_91 = arith.constant 3 : index
    %c0_92 = arith.constant 0 : index
    %c0_93 = arith.constant 0 : index
    %245 = vector.load %arg9[%c3_91, %c0_92, %c0_93] : memref<4x2x32xf32, #tpu.memory_space<vmem>>, vector<1x2x32xf32>
    %246 = vector.shape_cast %245 : vector<1x2x32xf32> to vector<2x32xf32>
    %247 = vector.shape_cast %231 : vector<2x32xf32> to vector<1x2x32xf32>
    tpu.vector_store %arg9[%c3_91, %c0_92, %c0_93], %247 {strides = array<i32>} : memref<4x2x32xf32, #tpu.memory_space<vmem>>, vector<1x2x32xf32>,
    %c0_94 = arith.constant 0 : index
    %c0_95 = arith.constant 0 : index
    %248 = vector.load %arg11[%c0_94, %c0_95] : memref<8x32xf32, #tpu.memory_space<vmem>>, vector<8x32xf32>
    %cst_96 = arith.constant dense<0.000000e+00> : vector<8xf32>
    %249 = vector.multi_reduction <add>, %248, %cst_96 [1] : vector<8x32xf32> to vector<8xf32>
    %250 = vector.shape_cast %249 : vector<8xf32> to vector<8x1xf32>
    %cst_97 = arith.constant 3.200000e+01 : f32
    %251 = vector.broadcast %cst_97 : f32 to vector<8x1xf32>
    %252 = arith.divf %250, %251 : vector<8x1xf32>
    %253 = vector.broadcast %252 : vector<8x1xf32> to vector<8x32xf32>
    %254 = arith.subf %248, %253 : vector<8x32xf32>
    %255 = arith.mulf %254, %254 : vector<8x32xf32>
    %cst_98 = arith.constant dense<0.000000e+00> : vector<8xf32>
    %256 = vector.multi_reduction <add>, %255, %cst_98 [1] : vector<8x32xf32> to vector<8xf32>
    %257 = vector.shape_cast %256 : vector<8xf32> to vector<8x1xf32>
    %cst_99 = arith.constant 3.200000e+01 : f32
    %258 = vector.broadcast %cst_99 : f32 to vector<8x1xf32>
    %259 = arith.divf %257, %258 : vector<8x1xf32>
    %cst_100 = arith.constant 9.99999974E-6 : f32
    %260 = vector.broadcast %cst_100 : f32 to vector<8x1xf32>
    %261 = arith.addf %259, %260 : vector<8x1xf32>
    %262 = math.rsqrt %261 : vector<8x1xf32>
    %263 = vector.broadcast %262 : vector<8x1xf32> to vector<8x32xf32>
    %264 = arith.mulf %254, %263 : vector<8x32xf32>
    %cst_101 = arith.constant dense<0.000000e+00> : vector<8x32xf32>
    %265 = tpu.matmul %264, %62, %cst_101 {dimension_numbers = #tpu.dot_dimension_numbers<[1], [0], [0], [1], [0, 0, 1, 1], [], []>} : vector<8x32xf32>, vector<32x32xf32>, vector<8x32xf32> -> vector<8x32xf32>
    %c0_102 = arith.constant 0 : index
    %c768 = arith.constant 768 : index
    %266 = vector.load %arg6[%c0_102, %c768] : memref<1x1024xf32, #tpu.memory_space<vmem>>, vector<1x32xf32>
    %267 = vector.broadcast %266 : vector<1x32xf32> to vector<8x32xf32>
    %268 = arith.addf %265, %267 : vector<8x32xf32>
    %cst_103 = arith.constant 0.000000e+00 : f32
    %269 = vector.broadcast %cst_103 : f32 to vector<8x32xf32>
    %270 = arith.maximumf %268, %269 : vector<8x32xf32>
    %cst_104 = arith.constant dense<0.000000e+00> : vector<8x128xf32>
    %271 = tpu.matmul %270, %61, %cst_104 {dimension_numbers = #tpu.dot_dimension_numbers<[1], [0], [0], [1], [0, 0, 1, 1], [], []>} : vector<8x32xf32>, vector<32x128xf32>, vector<8x128xf32> -> vector<8x128xf32>
    %c0_105 = arith.constant 0 : index
    %c896 = arith.constant 896 : index
    %272 = vector.load %arg6[%c0_105, %c896] : memref<1x1024xf32, #tpu.memory_space<vmem>>, vector<1x128xf32>
    %273 = vector.broadcast %272 : vector<1x128xf32> to vector<8x128xf32>
    %274 = arith.addf %271, %273 : vector<8x128xf32>
    %275 = math.tanh %274 : vector<8x128xf32>
    %c0_106 = arith.constant 0 : index
    %c0_107 = arith.constant 0 : index
    %276 = vector.load %arg8[%c0_106, %c0_107] : memref<8x128xf32, #tpu.memory_space<vmem>>, vector<8x128xf32>
    tpu.vector_store %arg8[%c0_106, %c0_107], %275 {strides = array<i32>} : memref<8x128xf32, #tpu.memory_space<vmem>>, vector<8x128xf32>,
    return
  }
}

</mosaic_0001>

<bundles_post_ra>
// kernel: forward.1
= control target key start
LH: loop header
LB: loop body
LE: loop exit
PB: predicated region body
PF: predicated region fallthrough
CT: control target
= control target key end

     0   :  { %v2222_v3 = vmov 0.0   ;;  %v2223_v4 = vmov 0.0|0.0   ;;  %vm60_vm0 = vcmask 523264   ;;  %vm173_vm1 = vcmask 850944   ;;  %s2225_s14 = smov 64   ;;  %s2226_s28 = smov 32   ;;  %s2764_s1 = inlined_call_operand.vmem [shape: f32[64,232], index: 1, kind: input, shape index: {}]   ;;  %s2765_s2 = inlined_call_operand.vmem [shape: f32[232,96], index: 2, kind: input, shape index: {}]   ;;  %s2766_s0 = inlined_call_operand.vmem [shape: f32[8,68], index: 0, kind: input, shape index: {}]   ;;  %s2767_s3 = inlined_call_operand.vmem [shape: f32[96,24], index: 3, kind: input, shape index: {}]   ;;  %s2768_s6 = inlined_call_operand.vmem [shape: f32[1,1024], index: 6, kind: input, shape index: {}]   ;;  %s2769_s4 = inlined_call_operand.vmem [shape: f32[28,128], index: 4, kind: input, shape index: {}]   ;;  %s2770_s5 = inlined_call_operand.vmem [shape: f32[32,544], index: 5, kind: input, shape index: {}]   ;;  %s2771_s7 = inlined_call_operand.vmem [shape: f32[4,2,32], index: 7, kind: input, shape index: {}]   ;;  %s2772_s9 = inlined_call_operand.vmem [shape: f32[4,2,32], index: 9, kind: output, shape index: {1}]   ;;  %s2773_s8 = inlined_call_operand.vmem [shape: f32[8,128], index: 8, kind: output, shape index: {0}]  }
   0x1   :  { %v33_v0 = vld [vmem:[%s2764_s1 + $0x8] sm:$0xff]  ;;  %v35_v1 = vld [vmem:[%s2764_s1 + $0x18] sm:$0xff]  ;;  %v32_v2 = vld [vmem:[%s2764_s1] sm:$0xff]  ;;  %128 = vmatprep.mubr.f32.mxu0 %v2222_v3  ;;  %2017 = vmatprep.subr.bf16.mxu1 %v2223_v4  ;;  %vm2224_vm2 = vmmov 0   ;;  %vm267_vm3 = vcmask 785408   ;;  %vm349_vm4 = vcmask 31744  }
   0x2   :  { %v2001_v5 = vpack.c.bf16 %v35_v1, %v33_v0  ;;  %v34_v6 = vld [vmem:[%s2764_s1 + $0x10] sm:$0xff]  ;;  %v37_v7 = vld [vmem:[%s2764_s1 + $0x28] sm:$0xff]  ;;  %v39_v8 = vld [vmem:[%s2764_s1 + $0x38] sm:$0xff]  ;;  %vm342_vm5 = vcmask 195584   ;;  %vm385_vm6 = vcmask 1043456   ;;  %vm563_vm7 = vcmask 261120  }
   0x3   :  { %v2003_v9 = vpack.c.bf16 %v34_v6, %v32_v2  ;;  %v2005_v10 = vpack.c.bf16 %v39_v8, %v37_v7  ;;  %v36_v11 = vld [vmem:[%s2764_s1 + $0x20] sm:$0xff]  ;;  %v38_v12 = vld [vmem:[%s2764_s1 + $0x30] sm:$0xff]  ;;  %v41_v13 = vld [vmem:[%s2764_s1 + $0x48] sm:$0xff]  ;;  %vm670_vm8 = vcmask 254976   ;;  %vm779_vm9 = vcmask 257026  }
   0x4   :  { %2002 = vmatprep.subr.bf16.mxu0 %v2001_v5  ;;  %v43_v14 = vld [vmem:[%s2764_s1 + $0x58] sm:$0xff]  ;;  %v2007_v15 = vpack.c.bf16 %v38_v12, %v36_v11  ;;  %v40_v16 = vld [vmem:[%s2764_s1 + $0x40] sm:$0xff]  ;;  %v42_v17 = vld [vmem:[%s2764_s1 + $0x50] sm:$0xff]  ;;  %vm891_vm10 = vcmask 259076   ;;  %vm1003_vm11 = vcmask 261126  }
   0x5   :  { %2004 = vmatpush1.bf16.msra.mxu0 %v2003_v9  ;;  %v2009_v18 = vpack.c.bf16 %v43_v14, %v41_v13  ;;  %v45_v19 = vld [vmem:[%s2764_s1 + $0x68] sm:$0xff]  ;;  %v47_v20 = vld [vmem:[%s2764_s1 + $0x78] sm:$0xff]  ;;  %v137_v21 = vld [vmem:[%s2765_s2] sm:$0xff]  ;;  %v2011_v26 = vpack.c.bf16 %v42_v17, %v40_v16 }
   0x6   :  { %2006 = vmatprep.subr.bf16.mxu0 %v2005_v10  ;;  %v138_v22 = vld [vmem:[%s2765_s2 + $0x8] sm:$0xff]  ;;  %v139_v23 = vld [vmem:[%s2765_s2 + $0x10] sm:$0xff]  ;;  %v140_v24 = vld [vmem:[%s2765_s2 + $0x18] sm:$0xff]  ;;  %v2013_v27 = vpack.c.bf16 %v47_v20, %v45_v19 }
   0x7   :  { %v2018_v25 = vpack.c.bf16 %v138_v22, %v137_v21  ;;  %v44_v28 = vld [vmem:[%s2764_s1 + $0x60] sm:$0xff]  ;;  %v46_v29 = vld [vmem:[%s2764_s1 + $0x70] sm:$0xff]  ;;  %v2021_v30 = vpack.c.bf16 %v140_v24, %v139_v23  ;;  %v142_v32 = vld [vmem:[%s2765_s2 + $0x28] sm:$0xff]  ;;  %v50_v23 = vlaneseq }
   0x8   :  { %v141_v31 = vld [vmem:[%s2765_s2 + $0x20] sm:$0xff]  ;;  %v2015_v33 = vpack.c.bf16 %v46_v29, %v44_v28  ;;  %v143_v35 = vld [vmem:[%s2765_s2 + $0x30] sm:$0xff]  ;;  %v144_v36 = vld [vmem:[%s2765_s2 + $0x38] sm:$0xff] }
   0x9   :  { %2008 = vmatpush1.bf16.msra.mxu0 %v2007_v15  ;;  %2019 = vmatpush1.bf16.msra.mxu1 %v2018_v25  ;;  %v2024_v34 = vpack.c.bf16 %v142_v32, %v141_v31  ;;  %v2357_v37 = vld [vmem:[%s2766_s0] sm:$0xff]  ;;  %v2027_v38 = vpack.c.bf16 %v144_v36, %v143_v35  ;;  %v146_v40 = vld [vmem:[%s2765_s2 + $0x48] sm:$0xff]  ;;  %v147_v42 = vld [vmem:[%s2765_s2 + $0x50] sm:$0xff]  ;;  %v51_v24 = vshrl.u32 %v50_v23, 7 }
   0xa   :  { %2010 = vmatprep.subr.bf16.mxu0 %v2009_v18  ;;  %2020 = vmatprep.subr.bf16.mxu1 %v2223_v4  ;;  %v145_v39 = vld [vmem:[%s2765_s2 + $0x40] sm:$0xff]  ;;  %v148_v43 = vld [vmem:[%s2765_s2 + $0x58] sm:$0xff]  ;;  %v150_v46 = vld [vmem:[%s2765_s2 + $0x68] sm:$0xff] }
   0xb   :  { %v2030_v41 = vpack.c.bf16 %v146_v40, %v145_v39  ;;  %v2033_v44 = vpack.c.bf16 %v148_v43, %v147_v42  ;;  %v149_v45 = vld [vmem:[%s2765_s2 + $0x60] sm:$0xff]  ;;  %v151_v48 = vld [vmem:[%s2765_s2 + $0x70] sm:$0xff]  ;;  %v152_v49 = vld [vmem:[%s2765_s2 + $0x78] sm:$0xff]  ;;  %v52_v25 = vsub.s32 0, %v51_v24  ;;  %346 = vrot.lane.b32.xlu0 %v2357_v37, %s2225_s14 }
   0xc   :  { %v2036_v47 = vpack.c.bf16 %v150_v46, %v149_v45  ;;  %v2039_v50 = vpack.c.bf16 %v152_v49, %v151_v48  ;;  %v153_v51 = vld [vmem:[%s2765_s2 + $0x80] sm:$0xff]  ;;  %v154_v52 = vld [vmem:[%s2765_s2 + $0x88] sm:$0xff]  ;;  %v155_v54 = vld [vmem:[%s2765_s2 + $0x90] sm:$0xff] }
   0xd   :  { %2012 = vmatpush1.bf16.msra.mxu0 %v2011_v26  ;;  %2022 = vmatpush1.bf16.msra.mxu1 %v2021_v30  ;;  %v2042_v53 = vpack.c.bf16 %v154_v52, %v153_v51  ;;  %v156_v55 = vld [vmem:[%s2765_s2 + $0x98] sm:$0xff]  ;;  %v157_v57 = vld [vmem:[%s2765_s2 + $0xa0] sm:$0xff]  ;;  %v158_v58 = vld [vmem:[%s2765_s2 + $0xa8] sm:$0xff] }
   0xe   :  { %2014 = vmatprep.subr.bf16.mxu0 %v2013_v27  ;;  %2023 = vmatprep.subr.bf16.mxu1 %v2223_v4  ;;  %v2045_v56 = vpack.c.bf16 %v156_v55, %v155_v54  ;;  %v2048_v59 = vpack.c.bf16 %v158_v58, %v157_v57  ;;  %v159_v60 = vld [vmem:[%s2765_s2 + $0xb0] sm:$0xff]  ;;  %v160_v61 = vld [vmem:[%s2765_s2 + $0xb8] sm:$0xff]  ;;  %v161_v63 = vld [vmem:[%s2765_s2 + $0xc0] sm:$0xff]  ;;  %v56_v27 = vsub.s32 1, %v51_v24 }
   0xf   :  { %v2051_v62 = vpack.c.bf16 %v160_v61, %v159_v60  ;;  %v162_v0 = vld [vmem:[%s2765_s2 + $0xc8] sm:$0xff]  ;;  %v163_v2 = vld [vmem:[%s2765_s2 + $0xd0] sm:$0xff]  ;;  %v164_v5 = vld [vmem:[%s2765_s2 + $0xd8] sm:$0xff] }
  0x10   :  { %v2054_v1 = vpack.c.bf16 %v162_v0, %v161_v63  ;;  %v2057_v6 = vpack.c.bf16 %v164_v5, %v163_v2  ;;  %v165_v7 = vld [vmem:[%s2765_s2 + $0xe0] sm:$0xff]  ;;  %v249_v9 = vld [vmem:[%s2767_s3 + $0x8] sm:$0xff]  ;;  %v250_v10 = vld [vmem:[%s2767_s3 + $0x10] sm:$0xff] }
  0x11   :  { %2016 = vmatpush1.bf16.msra.mxu0 %v2015_v33  ;;  %2025 = vmatpush1.bf16.msra.mxu1 %v2024_v34  ;;  %v248_v8 = vld [vmem:[%s2767_s3] sm:$0xff]  ;;  %v251_v12 = vld [vmem:[%s2767_s3 + $0x18] sm:$0xff]  ;;  %v253_v15 = vld [vmem:[%s2767_s3 + $0x28] sm:$0xff] }
  0x12   :  { %2059 = vmatprep.subr.bf16.mxu0 %v2223_v4  ;;  %2026 = vmatprep.subr.bf16.mxu1 %v2223_v4  ;;  %v2060_v11 = vpack.c.bf16 %v249_v9, %v248_v8  ;;  %v2063_v13 = vpack.c.bf16 %v251_v12, %v250_v10  ;;  %v252_v14 = vld [vmem:[%s2767_s3 + $0x20] sm:$0xff]  ;;  %v254_v17 = vld [vmem:[%s2767_s3 + $0x30] sm:$0xff]  ;;  %v255_v18 = vld [vmem:[%s2767_s3 + $0x38] sm:$0xff] }
  0x13   :  { %v2066_v16 = vpack.c.bf16 %v253_v15, %v252_v14  ;;  %v2069_v19 = vpack.c.bf16 %v255_v18, %v254_v17  ;;  %v256_v20 = vld [vmem:[%s2767_s3 + $0x40] sm:$0xff]  ;;  %v257_v21 = vld [vmem:[%s2767_s3 + $0x48] sm:$0xff]  ;;  %v258_v36 = vld [vmem:[%s2767_s3 + $0x50] sm:$0xff] }
  0x14   :  { %1728 = vmatmul.mubr.msk.f32.vlgmr.msra.gmra.mrb[0].mxu0 %vm60_vm0, %v2357_v37  ;;  %v2072_v22 = vpack.c.bf16 %v257_v21, %v256_v20  ;;  %v48_v26 = vld [vmem:[%s2768_s6] sm:$0x3]  ;;  %v1729_v40 = vld [vmem:[%s2768_s6 + $0x2] ss:$0 sm:$0xff]  ;;  %v379_v0 = vld [vmem:[%s2769_s4 + $0x18] sm:$0xf] }
  0x15   :  { %2028 = vmatpush1.bf16.msra.mxu1 %v2027_v38  ;;  %2061 = vmatpush3.bf16.msra.mxu0 %v2060_v11  ;;  %v53_v28 = vrot.slane %v48_v26, %v52_v25  ;;  %v57_v29 = vrot.slane %v48_v26, %v56_v27  ;;  %v259_v38 = vld [vmem:[%s2767_s3 + $0x58] sm:$0xff]  ;;  %v541_v8 = vld [vmem:[%s2770_s5 + $0x28] sm:$0xff]  ;;  %v542_v10 = vld [vmem:[%s2770_s5 + $0x50] sm:$0xff] }
  0x16   :  { %2029 = vmatprep.subr.bf16.mxu1 %v2223_v4  ;;  %2062 = vmatprep.subr.bf16.mxu0 %v2223_v4  ;;  %v2075_v39 = vpack.c.bf16 %v259_v38, %v258_v36  ;;  %v543_v11 = vld [vmem:[%s2770_s5 + $0x78] sm:$0xff]  ;;  %v1737_v15 = vld [vmem:[%s2771_s7 + $0x4] sm:$0x3]  ;;  %v377_v17 = vld [vmem:[%s2769_s4 + $0x8] sm:$0xff] }
  0x17   :  { %1863 = vmatprep.mubr.msk.f32.mxu0 %vm2224_vm2, %v2222_v3  ;;  %v2522_v12 = vpack.c.bf16 %v543_v11, %v542_v10  ;;  %v378_v20 = vld [vmem:[%s2769_s4 + $0x10] sm:$0xff] }
  0x19   :  { %2031 = vmatpush1.bf16.msra.mxu1 %v2030_v41  ;;  %2064 = vmatpush3.bf16.msra.mxu0 %v2063_v13 }
  0x1a   :  { %2032 = vmatprep.subr.bf16.mxu1 %v2223_v4  ;;  %2065 = vmatprep.subr.bf16.mxu0 %v2223_v4 }
  0x1d   :  { %2034 = vmatpush1.bf16.msra.mxu1 %v2033_v44  ;;  %2067 = vmatpush3.bf16.msra.mxu0 %v2066_v16  ;;  %v376_v16 = vld [vmem:[%s2769_s4] sm:$0xff] }
  0x1e   :  { %2035 = vmatprep.subr.bf16.mxu1 %v2223_v4  ;;  %2068 = vmatprep.subr.bf16.mxu0 %v2223_v4  ;;  %v2078_v18 = vpack.c.bf16 %v377_v17, %v376_v16 }
  0x21   :  { %2037 = vmatpush1.bf16.msra.mxu1 %v2036_v47  ;;  %2070 = vmatpush3.bf16.msra.mxu0 %v2069_v19  ;;  %v1731_v47 = vld [vmem:[%s2768_s6 + $0x3] ss:$0 sm:$0xff] }
  0x22   :  { %2038 = vmatprep.subr.bf16.mxu1 %v2223_v4  ;;  %2071 = vmatprep.subr.bf16.mxu0 %v2223_v4 }
  0x25   :  { %2040 = vmatpush1.bf16.msra.mxu1 %v2039_v50  ;;  %2073 = vmatpush3.bf16.msra.mxu0 %v2072_v22  ;;  %v560_v22 = vld [vmem:[%s2771_s7] sm:$0x3] }
  0x26   :  { %2041 = vmatprep.subr.bf16.mxu1 %v2223_v4  ;;  %2074 = vmatprep.subr.bf16.mxu0 %v2223_v4 }
  0x29   :  { %2043 = vmatpush1.bf16.msra.mxu1 %v2042_v53  ;;  %2076 = vmatpush3.bf16.msra.mxu0 %v2075_v39 }
  0x2a   :  { %2044 = vmatprep.subr.bf16.mxu1 %v2223_v4  ;;  %1866 = vmatprep.subr.mxu0 %v2222_v3 }
  0x2d   :  { %2046 = vmatpush1.bf16.msra.mxu1 %v2045_v56 }
  0x2e   :  { %2047 = vmatprep.subr.bf16.mxu1 %v2223_v4 }
  0x31   :  { %2049 = vmatpush1.bf16.msra.mxu1 %v2048_v59 }
  0x32   :  { %2050 = vmatprep.subr.bf16.mxu1 %v2223_v4 }
  0x35   :  { %2052 = vmatpush1.bf16.msra.mxu1 %v2051_v62 }
  0x36   :  { %2053 = vmatprep.subr.bf16.mxu1 %v2223_v4 }
  0x39   :  { %2055 = vmatpush1.bf16.msra.mxu1 %v2054_v1 }
  0x3a   :  { %2056 = vmatprep.subr.bf16.mxu1 %v2223_v4 }
  0x3d   :  { %2058 = vmatpush1.bf16.msra.mxu1 %v2057_v6 }
  0x3e   :  { %233 = vmatprep.subr.mxu1 %v2222_v3 }
  0x41   :  { %234 = vmatpush1.msra.mxu1 %v165_v7  ;;  %v540_v7 = vld [vmem:[%s2770_s5] sm:$0xff] }
  0x42   :  { %2092 = vmatprep.subr.bf16.mxu1 %v2223_v4  ;;  %v2512_v9 = vpack.c.bf16 %v541_v8, %v540_v7 }
  0x7d   :  { %v347_v45 = vpop.permute.xlu0 %346 }
  0x7e   :  { %v350_v46 = vsel %vm349_vm4, %v347_v45, 0.0 }
  0x7f   :  { %351 = vadd.xlane.f32.xlu1 %v350_v46 }
  0xe7   :  { %v130_v30 = vpop.f32.mrb[0].mxu0 }
  0xe8   :  { %v131_v31 = vadd.f32 %v130_v30, %v53_v28  ;;  %v132_v32 = vpop.f32.mrb[1].mxu0  ;;  %v1736_v28 = vld [vmem:[%s2768_s6 + $0x4] ss:$0 sm:$0xff] }
  0xe9   :  { %v133_v33 = vadd.f32 %v132_v32, %v57_v29 }
  0xea   :  { %v135_v35 = vmax.f32 %v131_v31, 0.0 }
  0xeb   :  { %v136_v34 = vmax.f32 %v133_v33, 0.0 }
  0xed   :  { %1730 = vmatprep.mubr.msk.f32.mxu1 %vm173_vm1, %v136_v34 }
  0xee   :  { %242 = vmatmul.mubr.f32.vlgmr.msra.gmra.mrb[0].mxu1 %v135_v35 }
  0xef   :  { %1910 = vmatprep.mubr.msk.f32.mxu1 %vm2224_vm2, %v2222_v3  ;;  %2094 = vmatpush3.bf16.msra.mxu1 %v2512_v9 }
  0xf0   :  { %2095 = vmatprep.subr.bf16.mxu1 %v2223_v4 }
  0xf3   :  { %2097 = vmatpush3.bf16.msra.mxu1 %v2522_v12 }
  0xf4   :  { %2104 = vmatprep.subr.bf16.mxu1 %v2223_v4 }
 0x10c   :  { %v352_v53 = vpop.xlane.xlu1 %351 }
 0x1c1   :  { %v243_v41 = vpop.f32.mrb[0].mxu1 }
 0x1c2   :  { %v244_v42 = vadd.f32 %v1729_v40, %v243_v41  ;;  %v245_v43 = vpop.f32.mrb[1].mxu1 }
 0x1c4   :  { %v247_v44 = vmax.f32 %v244_v42, 0.0 }
 0x1c6   :  { %1864 = vmatmul.mubr.msk.f32.vlgmr.msra.gmra.mrb[2].mxu0 %vm267_vm3, %v247_v44 }
 0x1c7   :  { %1868 = vmatprep.mubr.msk.f32.mxu0 %vm2224_vm2, %v2222_v3  ;;  %1867 = vmatpush3.msk.msra.mxu0 %vm385_vm6, %v379_v0 }
 0x1c8   :  { %2077 = vmatprep.subr.bf16.mxu0 %v2223_v4 }
 0x299   :  { %v337_v48 = vpop.f32.mrb[2].mxu0 }
 0x29a   :  { %v338_v49 = vadd.f32 %v1731_v47, %v337_v48  ;;  %v1865_v50 = vpop.f32.mrb[3].mxu0 }
 0x29c   :  { %v341_v51 = vmax.f32 %v338_v49, 0.0 }
 0x29e   :  { %v343_v52 = vsel %vm342_vm5, %v341_v51, 0.0 }
 0x29f   :  { %344 = vadd.xlane.f32.xlu0 %v343_v52 }
 0x32c   :  { %v345_v54 = vpop.xlane.xlu0 %344 }
 0x32d   :  { %v353_v55 = vadd.f32 %v352_v53, %v345_v54 }
 0x32f   :  { %v355_v56 = vmul.f32 0.035714287, %v353_v55 }
 0x331   :  { %v357_v57 = vsub.f32 %v2357_v37, %v355_v56  ;;  %v356_v59 = vsub.f32 %v341_v51, %v355_v56 }
 0x333   :  { %v362_v58 = vmul.f32 %v357_v57, %v357_v57  ;;  %v358_v60 = vmul.f32 %v356_v59, %v356_v59 }
 0x335   :  { %364 = vrot.lane.b32.xlu1 %v362_v58, %s2225_s14  ;;  %v359_v61 = vsel %vm342_vm5, %v358_v60, 0.0 }
 0x359   :  { %360 = vadd.xlane.f32.xlu1 %v359_v61 }
 0x3a7   :  { %v365_v62 = vpop.permute.xlu1 %364 }
 0x3a8   :  { %v367_v63 = vsel %vm349_vm4, %v365_v62, 0.0 }
 0x3a9   :  { %368 = vadd.xlane.f32.xlu0 %v367_v63 }
 0x3e6   :  { %v361_v37 = vpop.xlane.xlu1 %360 }
 0x436   :  { %v369_v1 = vpop.xlane.xlu0 %368 }
 0x437   :  { %v370_v2 = vadd.f32 %v369_v1, %v361_v37 }
 0x439   :  { %v371_v5 = vmul.f32 0.035714287, %v370_v2 }
 0x43b   :  { %v372_v6 = vadd.f32 1e-05, %v371_v5 }
 0x43d   :  { %2152 = vrsqrt.f32 %v372_v6 }
 0x447   :  { %v2153_v13 = vpop.eup %2152 }
 0x448   :  { %v375_v14 = vmul.f32 %v2153_v13, %v357_v57  ;;  %v374_v21 = vmul.f32 %v2153_v13, %v356_v59 }
 0x44a   :  { %381 = vrot.lane.b32.xlu0 %v375_v14, %s2225_s14 }
 0x44e   :  { %646 = vrot.lane.b32.xlu0 %v1737_v15, %s2226_s28 }
 0x4bc   :  { %v382_v19 = vpop.permute.xlu0 %381 }
 0x4bd   :  { %1869 = vmatmul.mubr.msk.f32.vlgmr.msra.gmra.mrb[4].mxu0 %vm349_vm4, %v382_v19 }
 0x4be   :  { %2079 = vmatpush3.bf16.msra.mxu0 %v2078_v18  ;;  %1877 = vmatprep.mubr.msk.f32.mxu0 %vm2224_vm2, %v2222_v3 }
 0x4bf   :  { %1875 = vmatprep.subr.mxu0 %v2222_v3 }
 0x4c0   :  { %v647_v41 = vpop.permute.xlu0 %646 }
 0x4c2   :  { %1876 = vmatpush3.msra.mxu0 %v378_v20 }
 0x4c3   :  { %1878 = vmatmul.mubr.msk.f32.vlgmr.msra.gmra.mrb[6].mxu0 %vm342_vm5, %v374_v21  ;;  %2080 = vmatprep.subr.bf16.mxu0 %v2223_v4 }
 0x4c4   :  { %2082 = vmatpush3.bf16.msra.mxu0 %v2512_v9  ;;  %1888 = vmatprep.mubr.msk.f32.mxu0 %vm2224_vm2, %v2222_v3 }
 0x4c5   :  { %2083 = vmatprep.subr.bf16.mxu0 %v2223_v4 }
 0x4c8   :  { %2085 = vmatpush3.bf16.msra.mxu0 %v2522_v12 }
 0x4c9   :  { %2086 = vmatprep.subr.bf16.mxu0 %v2223_v4 }
 0x4cb   :  { %1889 = vmatmul.mubr.msk.f32.vlgmr.msra.gmra.mrb[8].mxu0 %vm563_vm7, %v560_v22 }
 0x4cc   :  { %2088 = vmatpush3.bf16.msra.mxu0 %v2512_v9  ;;  %1899 = vmatprep.mubr.msk.f32.mxu0 %vm2224_vm2, %v2222_v3 }
 0x4cd   :  { %2089 = vmatprep.subr.bf16.mxu0 %v2223_v4 }
 0x4d0   :  { %2091 = vmatpush3.bf16.msra.mxu0 %v2522_v12 }
 0x4d1   :  { %2098 = vmatprep.subr.bf16.mxu0 %v2223_v4 }
 0x590   :  { %v455_v23 = vpop.f32.mrb[4].mxu0 }
 0x591   :  { %v1870_v24 = vpop.f32.mrb[5].mxu0 }
 0x596   :  { %v528_v25 = vpop.f32.mrb[6].mxu0 }
 0x597   :  { %v529_v26 = vadd.f32 %v528_v25, %v455_v23  ;;  %v1879_v27 = vpop.f32.mrb[7].mxu0 }
 0x599   :  { %v2565_v29 = vadd.f32 %v1736_v28, %v529_v26 }
 0x59e   :  { %v633_v30 = vpop.f32.mrb[8].mxu0 }
 0x59f   :  { %v637_v31 = vadd.f32 %v633_v30, %v2565_v29  ;;  %v1890_v32 = vpop.f32.mrb[9].mxu0 }
 0x5a1   :  { %2154 = vtanh.f32 %v637_v31  ;;  %v1739_v34 = vmul.f32 -1.442695, %v637_v31 }
 0x5a3   :  { %2156 = vpow2.f32 %v1739_v34 }
 0x5ab   :  { %v2155_v33 = vpop.eup %2154 }
 0x5ac   :  { %651 = vrot.lane.b32.xlu1 %v2155_v33, %s2226_s28 }
 0x5ad   :  { %v2157_v35 = vpop.eup %2156 }
 0x5ae   :  { %v641_v36 = vadd.f32 1.0, %v2157_v35 }
 0x5b0   :  { %2158 = vrcp.f32 %v641_v36 }
 0x5ba   :  { %v2159_v38 = vpop.eup %2158 }
 0x5bb   :  { %v649_v42 = vmul.f32 %v2159_v38, %v647_v41 }
 0x61e   :  { %v652_v39 = vpop.permute.xlu1 %651 }
 0x61f   :  { %v654_v40 = vmul.f32 %v2159_v38, %v652_v39 }
 0x621   :  { %656 = vrot.lane.b32.xlu0 %v654_v40, %s2226_s28 }
 0x693   :  { %v657_v43 = vpop.permute.xlu0 %656 }
 0x694   :  { %v659_v44 = vadd.f32 %v657_v43, %v649_v42 }
 0x696   :  { %2160 = vtanh.f32 %v659_v44  ;;  %v756_v60 = vrot.slane %v659_v44, 6  ;;  %v548_v44 = vld [vmem:[%s2770_s5 + $0x10] sm:$0xff] }
 0x6a0   :  { %v2161_v45 = vpop.eup %2160 }
 0x6a1   :  { %662 = vrot.lane.b32.xlu0 %v2161_v45, %s2226_s28  ;;  %v549_v45 = vld [vmem:[%s2770_s5 + $0x38] sm:$0xff] }
 0x713   :  { %v663_v46 = vpop.permute.xlu0 %662 }
 0x714   :  { %v665_v47 = vmul.f32 %v2159_v38, %v663_v46  ;;  %v2105_v46 = vpack.c.bf16 %v549_v45, %v548_v44 }
 0x716   :  { %667 = vrot.lane.b32.xlu0 %v665_v47, %s2225_s14  ;;  %v544_v47 = vld [vmem:[%s2770_s5 + $0x8] sm:$0xff] }
 0x788   :  { %v668_v48 = vpop.permute.xlu0 %667 }
 0x789   :  { %671 = vst.msk [vmem:[#allocation2] sm:$0x3] %vm670_vm8, %v668_v48  ;;  %1900 = vmatmul.mubr.msk.f32.vlgmr.msra.gmra.mrb[10].mxu0 %vm563_vm7, %v668_v48  ;;  %v545_v48 = vld [vmem:[%s2770_s5 + $0x30] sm:$0xff] }
 0x78a   :  { %2100 = vmatpush3.bf16.msra.mxu0 %v2512_v9  ;;  %1921 = vmatprep.mubr.msk.f32.mxu0 %vm2224_vm2, %v2222_v3 }
 0x78b   :  { %2101 = vmatprep.subr.bf16.mxu0 %v2223_v4 }
 0x78e   :  { %2103 = vmatpush3.bf16.msra.mxu0 %v2522_v12 }
 0x78f   :  { %2110 = vmatprep.subr.bf16.mxu0 %v2223_v4 }
 0x85c   :  { %v740_v49 = vpop.f32.mrb[10].mxu0 }
 0x85d   :  { %v745_v50 = vrot.slane %v740_v49, 6  ;;  %v1901_v51 = vpop.f32.mrb[11].mxu0  ;;  %v2618_v49 = vpack.c.bf16 %v545_v48, %v544_v47 }
 0x85e   :  { %v551_v51 = vld [vmem:[%s2770_s5 + $0x88] sm:$0xff] }
 0x85f   :  { %v747_v52 = vadd.f32 %v745_v50, %v2565_v29  ;;  %v550_v50 = vld [vmem:[%s2770_s5 + $0x60] sm:$0xff] }
 0x861   :  { %2162 = vtanh.f32 %v747_v52  ;;  %v1741_v54 = vmul.f32 -1.442695, %v747_v52  ;;  %v546_v52 = vld [vmem:[%s2770_s5 + $0x58] sm:$0xff] }
 0x863   :  { %2164 = vpow2.f32 %v1741_v54  ;;  %v547_v54 = vld [vmem:[%s2770_s5 + $0x80] sm:$0xff] }
 0x86b   :  { %v2163_v53 = vpop.eup %2162 }
 0x86c   :  { %760 = vrot.lane.b32.xlu1 %v2163_v53, %s2226_s28  ;;  %v2108_v53 = vpack.c.bf16 %v551_v51, %v550_v50 }
 0x86d   :  { %v2165_v55 = vpop.eup %2164 }
 0x86e   :  { %v751_v56 = vadd.f32 1.0, %v2165_v55  ;;  %v2634_v55 = vpack.c.bf16 %v547_v54, %v546_v52 }
 0x870   :  { %2166 = vrcp.f32 %v751_v56  ;;  %v1748_v56 = vld [vmem:[%s2771_s7 + $0x2] sm:$0x3] }
 0x87a   :  { %v2167_v57 = vpop.eup %2166 }
 0x87b   :  { %v758_v61 = vmul.f32 %v2167_v57, %v756_v60  ;;  %v1749_v60 = vld [vmem:[%s2771_s7 + $0x6] sm:$0x3] }
 0x8de   :  { %v761_v58 = vpop.permute.xlu1 %760 }
 0x8df   :  { %v763_v59 = vmul.f32 %v2167_v57, %v761_v58 }
 0x8e1   :  { %765 = vrot.lane.b32.xlu0 %v763_v59, %s2226_s28 }
 0x953   :  { %v766_v62 = vpop.permute.xlu0 %765 }
 0x954   :  { %v768_v63 = vadd.f32 %v766_v62, %v758_v61 }
 0x956   :  { %2168 = vtanh.f32 %v768_v63  ;;  %v868_v17 = vrot.slane %v768_v63, 6 }
 0x960   :  { %v2169_v0 = vpop.eup %2168 }
 0x961   :  { %771 = vrot.lane.b32.xlu1 %v2169_v0, %s2226_s28 }
 0x9d3   :  { %v772_v37 = vpop.permute.xlu1 %771 }
 0x9d4   :  { %v774_v1 = vmul.f32 %v2167_v57, %v772_v37  ;;  %v1746_v37 = vld [vmem:[%s2768_s6 + $0x5] ss:$0 sm:$0xff] }
 0x9d6   :  { %v781_v2 = vrot.slane %v774_v1, 2 }
 0x9d8   :  { %782 = vrot.lane.b32.xlu0 %v781_v2, %s2225_s14 }
 0xa4a   :  { %v783_v5 = vpop.permute.xlu0 %782 }
 0xa4b   :  { %1911 = vmatmul.mubr.msk.f32.vlgmr.msra.gmra.mrb[2].mxu1 %vm563_vm7, %v783_v5 }
 0xa4c   :  { %1932 = vmatprep.mubr.msk.f32.mxu1 %vm2224_vm2, %v2222_v3  ;;  %2106 = vmatpush3.bf16.msra.mxu1 %v2105_v46 }
 0xa4d   :  { %2107 = vmatprep.subr.bf16.mxu1 %v2223_v4 }
 0xa50   :  { %2109 = vmatpush3.bf16.msra.mxu1 %v2108_v53 }
 0xa51   :  { %2116 = vmatprep.subr.bf16.mxu1 %v2223_v4 }
 0xb1e   :  { %v852_v6 = vpop.f32.mrb[2].mxu1 }
 0xb1f   :  { %v857_v7 = vrot.slane %v852_v6, 4  ;;  %v1912_v8 = vpop.f32.mrb[3].mxu1 }
 0xb21   :  { %v859_v9 = vadd.f32 %v857_v7, %v2565_v29 }
 0xb23   :  { %2170 = vtanh.f32 %v859_v9  ;;  %v1743_v11 = vmul.f32 -1.442695, %v859_v9 }
 0xb25   :  { %2172 = vpow2.f32 %v1743_v11 }
 0xb2d   :  { %v2171_v10 = vpop.eup %2170 }
 0xb2e   :  { %872 = vrot.lane.b32.xlu1 %v2171_v10, %s2226_s28 }
 0xb2f   :  { %v2173_v12 = vpop.eup %2172 }
 0xb30   :  { %v863_v13 = vadd.f32 1.0, %v2173_v12 }
 0xb32   :  { %2174 = vrcp.f32 %v863_v13 }
 0xb3c   :  { %v2175_v14 = vpop.eup %2174 }
 0xb3d   :  { %v870_v18 = vmul.f32 %v2175_v14, %v868_v17 }
 0xba0   :  { %v873_v15 = vpop.permute.xlu1 %872 }
 0xba1   :  { %v875_v16 = vmul.f32 %v2175_v14, %v873_v15 }
 0xba3   :  { %877 = vrot.lane.b32.xlu0 %v875_v16, %s2226_s28 }
 0xc15   :  { %v878_v19 = vpop.permute.xlu0 %877 }
 0xc16   :  { %v880_v20 = vadd.f32 %v878_v19, %v870_v18 }
 0xc18   :  { %2176 = vtanh.f32 %v880_v20  ;;  %v980_v39 = vrot.slane %v880_v20, 6 }
 0xc22   :  { %v2177_v21 = vpop.eup %2176 }
 0xc23   :  { %883 = vrot.lane.b32.xlu1 %v2177_v21, %s2226_s28 }
 0xc95   :  { %v884_v22 = vpop.permute.xlu1 %883 }
 0xc96   :  { %v886_v23 = vmul.f32 %v2175_v14, %v884_v22 }
 0xc98   :  { %v893_v24 = vrot.slane %v886_v23, 4 }
 0xc9a   :  { %894 = vrot.lane.b32.xlu0 %v893_v24, %s2225_s14 }
 0xd0c   :  { %v895_v25 = vpop.permute.xlu0 %894 }
 0xd0d   :  { %1922 = vmatmul.mubr.msk.f32.vlgmr.msra.gmra.mrb[12].mxu0 %vm563_vm7, %v895_v25 }
 0xd0e   :  { %1943 = vmatprep.mubr.msk.f32.mxu0 %vm2224_vm2, %v2222_v3  ;;  %2112 = vmatpush3.bf16.msra.mxu0 %v2618_v49 }
 0xd0f   :  { %2113 = vmatprep.subr.bf16.mxu0 %v2223_v4 }
 0xd12   :  { %2115 = vmatpush3.bf16.msra.mxu0 %v2634_v55 }
 0xd13   :  { %2122 = vmatprep.subr.bf16.mxu0 %v2223_v4 }
 0xd15   :  { %1944 = vmatmul.mubr.msk.f32.vlgmr.msra.gmra.mrb[14].mxu0 %vm563_vm7, %v1748_v56 }
 0xd16   :  { %2124 = vmatpush3.bf16.msra.mxu0 %v2618_v49  ;;  %1965 = vmatprep.mubr.msk.f32.mxu0 %vm2224_vm2, %v2222_v3 }
 0xd17   :  { %2125 = vmatprep.subr.bf16.mxu0 %v2223_v4 }
 0xd1a   :  { %2127 = vmatpush3.bf16.msra.mxu0 %v2634_v55 }
 0xd1b   :  { %2134 = vmatprep.subr.bf16.mxu0 %v2223_v4 }
 0xde0   :  { %v964_v26 = vpop.f32.mrb[12].mxu0 }
 0xde1   :  { %v969_v27 = vrot.slane %v964_v26, 2  ;;  %v1923_v28 = vpop.f32.mrb[13].mxu0 }
 0xde3   :  { %v971_v30 = vadd.f32 %v969_v27, %v2565_v29 }
 0xde5   :  { %2178 = vtanh.f32 %v971_v30  ;;  %v1745_v32 = vmul.f32 -1.442695, %v971_v30 }
 0xde7   :  { %2180 = vpow2.f32 %v1745_v32 }
 0xde8   :  { %v1159_v63 = vpop.f32.mrb[14].mxu0 }
 0xde9   :  { %v1945_v0 = vpop.f32.mrb[15].mxu0 }
 0xdef   :  { %v2179_v31 = vpop.eup %2178 }
 0xdf0   :  { %984 = vrot.lane.b32.xlu1 %v2179_v31, %s2226_s28 }
 0xdf1   :  { %v2181_v33 = vpop.eup %2180 }
 0xdf2   :  { %v975_v34 = vadd.f32 1.0, %v2181_v33 }
 0xdf4   :  { %2182 = vrcp.f32 %v975_v34 }
 0xdfe   :  { %v2183_v35 = vpop.eup %2182 }
 0xdff   :  { %v982_v40 = vmul.f32 %v2183_v35, %v980_v39 }
 0xe62   :  { %v985_v36 = vpop.permute.xlu1 %984 }
 0xe63   :  { %v987_v38 = vmul.f32 %v2183_v35, %v985_v36 }
 0xe65   :  { %989 = vrot.lane.b32.xlu0 %v987_v38, %s2226_s28 }
 0xe69   :  { %776 = vrot.lane.b32.xlu0 %v774_v1, %s2225_s14 }
 0xed7   :  { %v990_v41 = vpop.permute.xlu0 %989 }
 0xed8   :  { %v2600_v29 = vadd.f32 %v990_v41, %v982_v40 }
 0xeda   :  { %2184 = vtanh.f32 %v2600_v29 }
 0xedb   :  { %v777_v42 = vpop.permute.xlu0 %776 }
 0xedc   :  { %780 = vst.msk [vmem:[#allocation2] sm:$0xc] %vm779_vm9, %v777_v42 }
 0xee4   :  { %v2185_v43 = vpop.eup %2184 }
 0xee5   :  { %995 = vrot.lane.b32.xlu1 %v2185_v43, %s2226_s28 }
 0xee9   :  { %888 = vrot.lane.b32.xlu1 %v886_v23, %s2225_s14 }
 0xf57   :  { %v996_v57 = vpop.permute.xlu1 %995 }
 0xf58   :  { %v998_v58 = vmul.f32 %v2183_v35, %v996_v57 }
 0xf5a   :  { %1000 = vrot.lane.b32.xlu0 %v998_v58, %s2225_s14 }
 0xf5b   :  { %v889_v59 = vpop.permute.xlu1 %888 }
 0xf5c   :  { %892 = vst.msk [vmem:[#allocation2] sm:$0x30] %vm891_vm10, %v889_v59 }
 0xf5e   :  { %1172 = vrot.lane.b32.xlu0 %v1749_v60, %s2226_s28 }
 0xfcc   :  { %v1001_v61 = vpop.permute.xlu0 %1000 }
 0xfcd   :  { %1004 = vst.msk [vmem:[#allocation2] sm:$0xc0] %vm1003_vm11, %v1001_v61  ;;  %1527 = vst.msk [vmem:[%s2772_s9 - $0x6] sm:$0xc0] %vm1003_vm11, %v1001_v61 }
 0xfd0   :  { %v1173_v14 = vpop.permute.xlu0 %1172 }
 0xfd4   :  { %v1005_v62 = vld [vmem:[#allocation2] sm:$0xff] }
 0xfd5   :  { %1933 = vmatmul.mubr.msk.f32.vlgmr.msra.gmra.mrb[4].mxu1 %vm563_vm7, %v1005_v62 }
 0xfd6   :  { %2118 = vmatpush3.bf16.msra.mxu1 %v2618_v49  ;;  %1954 = vmatprep.mubr.msk.f32.mxu1 %vm2224_vm2, %v2222_v3 }
 0xfd7   :  { %2119 = vmatprep.subr.bf16.mxu1 %v2223_v4 }
 0xfda   :  { %2121 = vmatpush3.bf16.msra.mxu1 %v2634_v55 }
 0xfdb   :  { %2128 = vmatprep.subr.bf16.mxu1 %v2223_v4 }
0x10a8   :  { %v1082_v1 = vpop.f32.mrb[4].mxu1 }
0x10a9   :  { %v2671_v2 = vadd.f32 %v1746_v37, %v1082_v1  ;;  %v1934_v5 = vpop.f32.mrb[5].mxu1 }
0x10ab   :  { %v1163_v6 = vadd.f32 %v1159_v63, %v2671_v2 }
0x10ad   :  { %2186 = vtanh.f32 %v1163_v6  ;;  %v1751_v8 = vmul.f32 -1.442695, %v1163_v6 }
0x10af   :  { %2188 = vpow2.f32 %v1751_v8 }
0x10b7   :  { %v2187_v7 = vpop.eup %2186 }
0x10b8   :  { %1177 = vrot.lane.b32.xlu1 %v2187_v7, %s2226_s28 }
0x10b9   :  { %v2189_v9 = vpop.eup %2188 }
0x10ba   :  { %v1167_v10 = vadd.f32 1.0, %v2189_v9 }
0x10bc   :  { %2190 = vrcp.f32 %v1167_v10 }
0x10c6   :  { %v2191_v11 = vpop.eup %2190 }
0x10c7   :  { %v1175_v15 = vmul.f32 %v2191_v11, %v1173_v14 }
0x112a   :  { %v1178_v12 = vpop.permute.xlu1 %1177 }
0x112b   :  { %v1180_v13 = vmul.f32 %v2191_v11, %v1178_v12 }
0x112d   :  { %1182 = vrot.lane.b32.xlu1 %v1180_v13, %s2226_s28 }
0x119f   :  { %v1183_v16 = vpop.permute.xlu1 %1182 }
0x11a0   :  { %v1185_v17 = vadd.f32 %v1183_v16, %v1175_v15 }
0x11a2   :  { %2192 = vtanh.f32 %v1185_v17  ;;  %v1281_v34 = vrot.slane %v1185_v17, 6 }
0x11ac   :  { %v2193_v18 = vpop.eup %2192 }
0x11ad   :  { %1188 = vrot.lane.b32.xlu0 %v2193_v18, %s2226_s28 }
0x121f   :  { %v1189_v19 = vpop.permute.xlu0 %1188 }
0x1220   :  { %v1191_v20 = vmul.f32 %v2191_v11, %v1189_v19 }
0x1222   :  { %1193 = vrot.lane.b32.xlu1 %v1191_v20, %s2225_s14 }
0x1294   :  { %v1194_v21 = vpop.permute.xlu1 %1193 }
0x1295   :  { %1196 = vst.msk [vmem:[#allocation3] sm:$0x3] %vm670_vm8, %v1194_v21  ;;  %1955 = vmatmul.mubr.msk.f32.vlgmr.msra.gmra.mrb[6].mxu1 %vm563_vm7, %v1194_v21 }
0x1296   :  { %2130 = vmatpush3.bf16.msra.mxu1 %v2618_v49  ;;  %1976 = vmatprep.mubr.msk.f32.mxu1 %vm2224_vm2, %v2222_v3 }
0x1297   :  { %2131 = vmatprep.subr.bf16.mxu1 %v2223_v4 }
0x129a   :  { %2133 = vmatpush3.bf16.msra.mxu1 %v2634_v55 }
0x129b   :  { %2140 = vmatprep.subr.bf16.mxu1 %v2223_v4 }
0x1368   :  { %v1265_v22 = vpop.f32.mrb[6].mxu1 }
0x1369   :  { %v1270_v23 = vrot.slane %v1265_v22, 6  ;;  %v1956_v24 = vpop.f32.mrb[7].mxu1 }
0x136b   :  { %v1272_v25 = vadd.f32 %v1270_v23, %v2671_v2 }
0x136d   :  { %2194 = vtanh.f32 %v1272_v25  ;;  %v1753_v27 = vmul.f32 -1.442695, %v1272_v25 }
0x136f   :  { %2196 = vpow2.f32 %v1753_v27 }
0x1377   :  { %v2195_v26 = vpop.eup %2194 }
0x1378   :  { %1285 = vrot.lane.b32.xlu0 %v2195_v26, %s2226_s28 }
0x1379   :  { %v2197_v28 = vpop.eup %2196 }
0x137a   :  { %v1276_v30 = vadd.f32 1.0, %v2197_v28 }
0x137c   :  { %2198 = vrcp.f32 %v1276_v30  ;;  %v556_v30 = vld [vmem:[%s2770_s5 + $0x20] sm:$0xff] }
0x1386   :  { %v2199_v31 = vpop.eup %2198 }
0x1387   :  { %v1283_v35 = vmul.f32 %v2199_v31, %v1281_v34 }
0x13ea   :  { %v1286_v32 = vpop.permute.xlu0 %1285 }
0x13eb   :  { %v1288_v33 = vmul.f32 %v2199_v31, %v1286_v32 }
0x13ed   :  { %1290 = vrot.lane.b32.xlu1 %v1288_v33, %s2226_s28  ;;  %v559_v33 = vld [vmem:[%s2770_s5 + $0x98] sm:$0xff] }
0x145f   :  { %v1291_v36 = vpop.permute.xlu1 %1290 }
0x1460   :  { %v1293_v38 = vadd.f32 %v1291_v36, %v1283_v35  ;;  %v552_v35 = vld [vmem:[%s2770_s5 + $0x18] sm:$0xff]  ;;  %v553_v36 = vld [vmem:[%s2770_s5 + $0x40] sm:$0xff] }
0x1462   :  { %2200 = vtanh.f32 %v1293_v38  ;;  %v1392_v55 = vrot.slane %v1293_v38, 6  ;;  %v2141_v38 = vpack.c.bf16 %v553_v36, %v552_v35 }
0x146c   :  { %v2201_v39 = vpop.eup %2200 }
0x146d   :  { %1296 = vrot.lane.b32.xlu0 %v2201_v39, %s2226_s28 }
0x14df   :  { %v1297_v40 = vpop.permute.xlu0 %1296 }
0x14e0   :  { %v1299_v41 = vmul.f32 %v2199_v31, %v1297_v40  ;;  %v558_v31 = vld [vmem:[%s2770_s5 + $0x70] sm:$0xff] }
0x14e1   :  { %v2138_v34 = vpack.c.bf16 %v559_v33, %v558_v31 }
0x14e2   :  { %v1305_v42 = vrot.slane %v1299_v41, 2 }
0x14e4   :  { %1306 = vrot.lane.b32.xlu1 %v1305_v42, %s2225_s14 }
0x1556   :  { %v1307_v43 = vpop.permute.xlu1 %1306 }
0x1557   :  { %1966 = vmatmul.mubr.msk.f32.vlgmr.msra.gmra.mrb[16].mxu0 %vm563_vm7, %v1307_v43 }
0x1558   :  { %1987 = vmatprep.mubr.msk.f32.mxu0 %vm2224_vm2, %v2222_v3 }
0x162a   :  { %v1376_v44 = vpop.f32.mrb[16].mxu0 }
0x162b   :  { %v1381_v45 = vrot.slane %v1376_v44, 4  ;;  %v1967_v46 = vpop.f32.mrb[17].mxu0 }
0x162d   :  { %v1383_v47 = vadd.f32 %v1381_v45, %v2671_v2  ;;  %v554_v45 = vld [vmem:[%s2770_s5 + $0x68] sm:$0xff] }
0x162f   :  { %2202 = vtanh.f32 %v1383_v47  ;;  %v1755_v49 = vmul.f32 -1.442695, %v1383_v47  ;;  %v1761_v47 = vld [vmem:[%s2768_s6 + $0x6] ss:$0 sm:$0xff] }
0x1631   :  { %2204 = vpow2.f32 %v1755_v49 }
0x1639   :  { %v2203_v48 = vpop.eup %2202 }
0x163a   :  { %1396 = vrot.lane.b32.xlu0 %v2203_v48, %s2226_s28 }
0x163b   :  { %v2205_v50 = vpop.eup %2204 }
0x163c   :  { %v1387_v51 = vadd.f32 1.0, %v2205_v50 }
0x163e   :  { %2206 = vrcp.f32 %v1387_v51 }
0x1648   :  { %v2207_v52 = vpop.eup %2206 }
0x1649   :  { %v1394_v56 = vmul.f32 %v2207_v52, %v1392_v55 }
0x16ac   :  { %v1397_v53 = vpop.permute.xlu0 %1396 }
0x16ad   :  { %v1399_v54 = vmul.f32 %v2207_v52, %v1397_v53 }
0x16af   :  { %1401 = vrot.lane.b32.xlu1 %v1399_v54, %s2226_s28 }
0x1721   :  { %v1402_v57 = vpop.permute.xlu1 %1401 }
0x1722   :  { %v1404_v58 = vadd.f32 %v1402_v57, %v1394_v56 }
0x1724   :  { %2208 = vtanh.f32 %v1404_v58 }
0x172e   :  { %v2209_v59 = vpop.eup %2208 }
0x172f   :  { %1407 = vrot.lane.b32.xlu0 %v2209_v59, %s2226_s28 }
0x17a1   :  { %v1408_v60 = vpop.permute.xlu0 %1407 }
0x17a2   :  { %v1410_v61 = vmul.f32 %v2207_v52, %v1408_v60  ;;  %v1763_v52 = vld [vmem:[%s2768_s6 + $0x7] ss:$0 sm:$0xff] }
0x17a4   :  { %v1416_v62 = vrot.slane %v1410_v61, 4 }
0x17a6   :  { %1417 = vrot.lane.b32.xlu1 %v1416_v62, %s2225_s14 }
0x1818   :  { %v1418_v63 = vpop.permute.xlu1 %1417 }
0x1819   :  { %1977 = vmatmul.mubr.msk.f32.vlgmr.msra.gmra.mrb[8].mxu1 %vm563_vm7, %v1418_v63 }
0x181a   :  { %1998 = vmatprep.mubr.msk.f32.mxu1 %vm2224_vm2, %v2222_v3  ;;  %v1503_v3 = vrot.slane %v1404_v58, 6  ;;  %2142 = vmatpush3.bf16.msra.mxu1 %v2141_v38 }
0x181b   :  { %2143 = vmatprep.subr.bf16.mxu1 %v2223_v4 }
0x18ec   :  { %v1487_v0 = vpop.f32.mrb[8].mxu1 }
0x18ed   :  { %v1492_v37 = vrot.slane %v1487_v0, 2  ;;  %v1978_v1 = vpop.f32.mrb[9].mxu1 }
0x18ef   :  { %v1494_v5 = vadd.f32 %v1492_v37, %v2671_v2 }
0x18f1   :  { %2210 = vtanh.f32 %v1494_v5  ;;  %v1757_v7 = vmul.f32 -1.442695, %v1494_v5 }
0x18f3   :  { %2212 = vpow2.f32 %v1757_v7 }
0x18fb   :  { %v2211_v6 = vpop.eup %2210 }
0x18fc   :  { %1507 = vrot.lane.b32.xlu0 %v2211_v6, %s2226_s28 }
0x18fd   :  { %v2213_v8 = vpop.eup %2212 }
0x18fe   :  { %v1498_v9 = vadd.f32 1.0, %v2213_v8 }
0x1900   :  { %2214 = vrcp.f32 %v1498_v9 }
0x190a   :  { %v2215_v10 = vpop.eup %2214 }
0x190b   :  { %v1505_v13 = vmul.f32 %v2215_v10, %v1503_v3 }
0x196e   :  { %v1508_v11 = vpop.permute.xlu0 %1507 }
0x196f   :  { %v1510_v12 = vmul.f32 %v2215_v10, %v1508_v11 }
0x1971   :  { %1512 = vrot.lane.b32.xlu1 %v1510_v12, %s2226_s28 }
0x1975   :  { %1301 = vrot.lane.b32.xlu1 %v1299_v41, %s2225_s14 }
0x19e3   :  { %v1513_v14 = vpop.permute.xlu1 %1512 }
0x19e4   :  { %v1515_v2 = vadd.f32 %v1513_v14, %v1505_v13 }
0x19e6   :  { %2216 = vtanh.f32 %v1515_v2 }
0x19e7   :  { %v1302_v15 = vpop.permute.xlu1 %1301 }
0x19e8   :  { %1304 = vst.msk [vmem:[#allocation3] sm:$0xc] %vm779_vm9, %v1302_v15 }
0x19f0   :  { %v2217_v16 = vpop.eup %2216 }
0x19f1   :  { %1518 = vrot.lane.b32.xlu0 %v2217_v16, %s2226_s28  ;;  %s2227_s28 = smov 96  }
0x19f5   :  { %1412 = vrot.lane.b32.xlu0 %v1410_v61, %s2225_s14 }
0x1a63   :  { %v1519_v17 = vpop.permute.xlu0 %1518 }
0x1a64   :  { %v1521_v18 = vmul.f32 %v2215_v10, %v1519_v17 }
0x1a66   :  { %1523 = vrot.lane.b32.xlu1 %v1521_v18, %s2225_s14 }
0x1a67   :  { %v1413_v19 = vpop.permute.xlu0 %1412 }
0x1a68   :  { %1415 = vst.msk [vmem:[#allocation3] sm:$0x30] %vm891_vm10, %v1413_v19 }
0x1ad8   :  { %v1524_v20 = vpop.permute.xlu1 %1523 }
0x1ad9   :  { %1526 = vst.msk [vmem:[#allocation3] sm:$0xc0] %vm1003_vm11, %v1524_v20  ;;  %1758 = vst.msk [vmem:[%s2772_s9 - $0x4] sm:$0xc0] %vm1003_vm11, %v1524_v20 }
0x1ae0   :  { %v1542_v21 = vld [vmem:[#allocation3] sm:$0xff] }
0x1ae1   :  { %v1543_v22 = vsel %vm563_vm7, %v1542_v21, 0.0 }
0x1ae2   :  { %1544 = vadd.xlane.f32.xlu0 %v1543_v22 }
0x1af8   :  { %1531 = vrot.lane.b32.xlu0 %v2600_v29, %s2227_s28  ;;  %v557_v29 = vld [vmem:[%s2770_s5 + $0x48] sm:$0xff] }
0x1af9   :  { %v2135_v32 = vpack.c.bf16 %v557_v29, %v556_v30 }
0x1afb   :  { %2136 = vmatpush3.bf16.msra.mxu0 %v2135_v32 }
0x1afc   :  { %2137 = vmatprep.subr.bf16.mxu0 %v2223_v4  ;;  %v555_v4 = vld [vmem:[%s2770_s5 + $0x90] sm:$0xff] }
0x1afd   :  { %v2144_v46 = vpack.c.bf16 %v555_v4, %v554_v45 }
0x1aff   :  { %2139 = vmatpush3.bf16.msra.mxu0 %v2138_v34  ;;  %2145 = vmatpush3.bf16.msra.mxu1 %v2144_v46 }
0x1b6f   :  { %v1545_v23 = vpop.xlane.xlu0 %1544 }
0x1b70   :  { %v1547_v24 = vmul.f32 0.03125, %v1545_v23 }
0x1b72   :  { %v1548_v25 = vsub.f32 %v1542_v21, %v1547_v24 }
0x1b73   :  { %v1532_v26 = vpop.permute.xlu0 %1531 }
0x1b74   :  { %1759 = vst.msk [vmem:[%s2772_s9 - $0x2] sm:$0xc0] %vm1003_vm11, %v1532_v26  ;;  %v1549_v27 = vmul.f32 %v1548_v25, %v1548_v25 }
0x1b76   :  { %v1550_v28 = vsel %vm563_vm7, %v1549_v27, 0.0 }
0x1b77   :  { %1551 = vadd.xlane.f32.xlu1 %v1550_v28 }
0x1b88   :  { %1537 = vrot.lane.b32.xlu1 %v1515_v2, %s2227_s28 }
0x1c04   :  { %v1552_v39 = vpop.xlane.xlu1 %1551 }
0x1c05   :  { %v1553_v40 = vmul.f32 0.03125, %v1552_v39 }
0x1c07   :  { %v1554_v41 = vadd.f32 1e-05, %v1553_v40 }
0x1c08   :  { %v1538_v42 = vpop.permute.xlu1 %1537 }
0x1c09   :  { %2218 = vrsqrt.f32 %v1554_v41  ;;  %1760 = vst.msk [vmem:[%s2772_s9] sm:$0xc0] %vm1003_vm11, %v1538_v42 }
0x1c13   :  { %v2219_v43 = vpop.eup %2218 }
0x1c14   :  { %v1556_v44 = vmul.f32 %v2219_v43, %v1548_v25 }
0x1c16   :  { %1988 = vmatmul.mubr.msk.f32.vlgmr.msra.gmra.mrb[18].mxu0 %vm563_vm7, %v1556_v44 }
0x1ce9   :  { %v1633_v48 = vpop.f32.mrb[18].mxu0 }
0x1cea   :  { %v1634_v49 = vadd.f32 %v1761_v47, %v1633_v48  ;;  %v1989_v50 = vpop.f32.mrb[19].mxu0 }
0x1cec   :  { %v1637_v51 = vmax.f32 %v1634_v49, 0.0 }
0x1cee   :  { %1999 = vmatmul.mubr.msk.f32.vlgmr.msra.gmra.mrb[10].mxu1 %vm563_vm7, %v1637_v51 }
0x1dc1   :  { %v1714_v53 = vpop.f32.mrb[10].mxu1 }
0x1dc2   :  { %v1715_v54 = vadd.f32 %v1763_v52, %v1714_v53  ;;  %v2000_v55 = vpop.f32.mrb[11].mxu1 }
0x1dc4   :  { %2220 = vtanh.f32 %v1715_v54 }
0x1dce   :  { %v2221_v56 = vpop.eup %2220 }
0x1dcf   :  { %1719 = vst [vmem:[%s2773_s8] sm:$0xff] %v2221_v56 }

</bundles_post_ra>
